<compile_context>
chip_gen: v5e
topology: v5e:2x2
jax: 0.10.0
libtpu: 0.0.40
codegen_flags: <defaults>
</compile_context>

<pallas_src>
import functools

import jax
import jax.numpy as jnp
from jax.experimental import pallas as pl
from jax.experimental.pallas import tpu as pltpu


def _round_up(x, m):
    return ((x + m - 1) // m) * m


# ----------------------------------------------------------------------------
# Pallas kernel: one (batch, pixel-tile) step of the bilinear warp
# ----------------------------------------------------------------------------
def _warp_kernel(def_ref, mesh_ref, imf_ref, out_ref, *,
                 Hp, Wp, TM, PC, PC_ext, n_chunks):
    """def_ref : (1, 2, TM) f32  flattened (dx, dy) for TM output pixels
       mesh_ref: (2, TM)    f32  flattened (col, row) integer mesh
       imf_ref : (1, C, P_img) f32  zero-padded image, flattened + zero-extended
       out_ref : (1, C, TM) f32  warped output, pixels on the lane dim"""
    C = out_ref.shape[1]

    dx = def_ref[0, 0:1, :]                      # (1, TM)
    dy = def_ref[0, 1:2, :]
    col = mesh_ref[0:1, :]
    row = mesh_ref[1:2, :]

    # Sample coordinates in the *padded* image frame (+1 pad offset), per spec.
    x = dx + col + 1.0
    y = dy + row + 1.0

    x0 = jnp.floor(x)
    y0 = jnp.floor(y)
    x0c = jnp.clip(x0, 0.0, Wp - 1.0)
    x1c = jnp.clip(x0 + 1.0, 0.0, Wp - 1.0)
    y0c = jnp.clip(y0, 0.0, Hp - 1.0)
    y1c = jnp.clip(y0 + 1.0, 0.0, Hp - 1.0)

    # Bilinear weights exactly as in the reference (uses the *clamped* x1/y1).
    wx = x1c - x
    wy = y1c - y
    # Validity masks (exactly 1.0 when the +1 corner was not clamped, else 0.0).
    # When a mask is 0 the reference's corner sits on a zero pad row/col, so
    # forcing the contribution to 0 reproduces it exactly.
    mx = x1c - x0c
    my = y1c - y0c
    wa = wx * wy                         # corner (y0c, x0c)   -> +0
    wb = wx * (1.0 - wy) * my            # corner (y1c, x0c)   -> +Wp
    wc = (1.0 - wx) * wy * mx            # corner (y0c, x1c)   -> +1
    wd = (1.0 - wx) * (1.0 - wy) * mx * my   # corner (y1c, x1c) -> +Wp+1

    # Flat padded-frame index of the anchor corner (y0c, x0c); always in
    # [0, Hp*Wp), so the one-hot below is exact (no aliasing, no holes).
    anchor = y0c.astype(jnp.int32) * Wp + x0c.astype(jnp.int32)   # (1, TM)

    # Loop-invariant iota for the chunk-local one-hot.
    piota = jax.lax.broadcasted_iota(jnp.int32, (PC, TM), 0)

    acc_a = jnp.zeros((C, TM), jnp.float32)
    acc_b = jnp.zeros((C, TM), jnp.float32)
    acc_c = jnp.zeros((C, TM), jnp.float32)
    acc_d = jnp.zeros((C, TM), jnp.float32)

    # Chunked contraction over the padded-pixel axis: bounds VMEM to O(PC*TM).
    for ci in range(n_chunks):
        base = ci * PC
        # Single 0/1 one-hot per chunk: 1 compare + 1 select per element.
        onehot = jnp.where(piota == (anchor - base), 1.0, 0.0)   # (PC, TM) f32
        # One aligned load of the extended chunk, then cheap shifted views for
        # the four bilinear corners (the image is zero-extended past P', so the
        # shifted views of the last chunk stay in bounds and read zeros).
        ext = imf_ref[0, :, base:base + PC_ext]                  # (C, PC_ext)
        va = ext[:, 0:PC]
        vc = ext[:, 1:1 + PC]
        vb = ext[:, Wp:Wp + PC]
        vd = ext[:, Wp + 1:Wp + 1 + PC]
        # Gather as MXU matmuls: (C, PC) @ (PC, TM) -> (C, TM), lane-dense TM.
        acc_a = acc_a + jnp.dot(va, onehot, preferred_element_type=jnp.float32)
        acc_b = acc_b + jnp.dot(vb, onehot, preferred_element_type=jnp.float32)
        acc_c = acc_c + jnp.dot(vc, onehot, preferred_element_type=jnp.float32)
        acc_d = acc_d + jnp.dot(vd, onehot, preferred_element_type=jnp.float32)

    out = wa * acc_a + wb * acc_b + wc * acc_c + wd * acc_d
    out_ref[0, :, :] = out.astype(out_ref.dtype)


# ----------------------------------------------------------------------------
# Public wrapper (NCHW in, NCHW out — matches the PyTorch module)
# ----------------------------------------------------------------------------
def spatial_transformer(moving_image, deformation_matrix, *,
                        tm_cap=1024, pc_cap=512):
    B, C, H, W = moving_image.shape
    assert deformation_matrix.shape == (B, 2, H, W)
    Hp, Wp = H + 2, W + 2
    Pp = Hp * Wp
    M = H * W

    # --- output-pixel tiling (lane dim); pad M so any H*W works ---
    if M <= tm_cap:
        TM = _round_up(M, 128)
        M_pad = TM
    else:
        TM = tm_cap                     # multiple of 128
        M_pad = _round_up(M, TM)
    nj = M_pad // TM

    # --- chunking of the padded-pixel contraction (P-aware, VMEM-bounded) ---
    PC = min(pc_cap, _round_up(Pp, 128))
    n_chunks = -(-Pp // PC)
    tail = _round_up(Wp + 1, 128)       # room for the +1/+Wp/+Wp+1 views
    P_img = n_chunks * PC + tail
    PC_ext = PC + tail

    # Zero spatial pad of 1 (== F.pad(im, (0,0,1,1,1,1,0,0)) in NHWC), kept in
    # NCHW so the flatten is a pure reshape; then zero-extend the flat axis so
    # shifted corner views never read out of bounds.
    imf = jnp.pad(moving_image.astype(jnp.float32),
                  ((0, 0), (0, 0), (1, 1), (1, 1))).reshape(B, C, Pp)
    imf = jnp.pad(imf, ((0, 0), (0, 0), (0, P_img - Pp)))

    deff = deformation_matrix.astype(jnp.float32).reshape(B, 2, M)
    deff = jnp.pad(deff, ((0, 0), (0, 0), (0, M_pad - M)))

    # Exact integer meshgrid (col, row) as a tiny extra input — no in-kernel
    # f32 division, exact for any image size.
    col = jnp.broadcast_to(jnp.arange(W, dtype=jnp.float32)[None, :],
                           (H, W)).reshape(M)
    row = jnp.broadcast_to(jnp.arange(H, dtype=jnp.float32)[:, None],
                           (H, W)).reshape(M)
    mesh = jnp.stack([col, row], axis=0)                      # (2, M)
    mesh = jnp.pad(mesh, ((0, 0), (0, M_pad - M)))

    kernel = functools.partial(_warp_kernel, Hp=Hp, Wp=Wp, TM=TM, PC=PC,
                               PC_ext=PC_ext, n_chunks=n_chunks)

    out = pl.pallas_call(
        kernel,
        out_shape=jax.ShapeDtypeStruct((B, C, M_pad), jnp.float32),
        grid_spec=pltpu.PrefetchScalarGridSpec(
            num_scalar_prefetch=0,
            grid=(B, nj),
            in_specs=[
                pl.BlockSpec((1, 2, TM), lambda b, j: (b, 0, j)),   # dx/dy tile
                pl.BlockSpec((2, TM), lambda b, j: (0, j)),         # mesh tile
                pl.BlockSpec((1, C, P_img), lambda b, j: (b, 0, 0)),  # image
            ],
            out_specs=pl.BlockSpec((1, C, TM), lambda b, j: (b, 0, j)),
        ),
        compiler_params=pltpu.CompilerParams(
            dimension_semantics=("parallel", "parallel"),
            vmem_limit_bytes=48 * 1024 * 1024),
    )(deff, mesh, imf)
    return out[:, :, :M].reshape(B, C, H, W)


# ----------------------------------------------------------------------------
# Pure-JAX reference (mirrors the PyTorch code) for correctness checking
# ----------------------------------------------------------------------------
def spatial_transformer_ref(moving, deform):
    B, C, H, W = moving.shape
    im = jnp.transpose(moving, (0, 2, 3, 1)).astype(jnp.float32)       # NHWC
    im = jnp.pad(im, ((0, 0), (1, 1), (1, 1), (0, 0)))
    Hp, Wp = H + 2, W + 2
    dx = deform[:, 0].astype(jnp.float32)
    dy = deform[:, 1].astype(jnp.float32)
    xm = jnp.arange(W, dtype=jnp.float32)[None, None, :]
    ym = jnp.arange(H, dtype=jnp.float32)[None, :, None]
    x = dx + xm + 1.0
    y = dy + ym + 1.0
    x0 = jnp.floor(x); x1 = x0 + 1.0
    y0 = jnp.floor(y); y1 = y0 + 1.0
    x0c = jnp.clip(x0, 0.0, Wp - 1.0); x1c = jnp.clip(x1, 0.0, Wp - 1.0)
    y0c = jnp.clip(y0, 0.0, Hp - 1.0); y1c = jnp.clip(y1, 0.0, Hp - 1.0)
    wx = x1c - x
    wy = y1c - y
    wa = wx * wy; wb = wx * (1.0 - wy); wc = (1.0 - wx) * wy; wd = (1.0 - wx) * (1.0 - wy)
    imf = im.reshape(B, Hp * Wp, C)

    def gather(yc, xc):
        idx = (yc * Wp + xc).astype(jnp.int32).reshape(B, -1, 1)       # (B, HW, 1)
        return jnp.take_along_axis(imf, idx, axis=1).reshape(B, H, W, C)

    out = (wa[..., None] * gather(y0c, x0c) + wb[..., None] * gather(y1c, x0c)
           + wc[..., None] * gather(y0c, x1c) + wd[..., None] * gather(y1c, x1c))
    return jnp.transpose(out, (0, 3, 1, 2))


if __name__ == "__main__":
    key = jax.random.PRNGKey(0)
    k_img, k_def = jax.random.split(key)

    B, C, H, W = 2, 4, 16, 16
    moving = jax.random.normal(k_img, (B, C, H, W), jnp.float32)
    # Displacements of a few pixels (exercises interior + clamped borders).
    deform = 1.5 * jax.random.normal(k_def, (B, 2, H, W), jnp.float32)

    warped = jax.jit(spatial_transformer)(moving, deform)
    jax.block_until_ready(warped)

    assert warped.shape == (B, C, H, W), warped.shape
    assert warped.dtype == jnp.float32

    ref = spatial_transformer_ref(moving, deform)
    max_err = float(jnp.max(jnp.abs(warped - ref)))
    assert max_err < 1e-3, f"max abs error vs reference: {max_err}"

    print("KERNEL_OK")
</pallas_src>

<mosaic_0001>
module attributes {stable_mosaic.version = 11 : i64} {
  func.func @_warp_kernel(%arg0: i32, %arg1: i32, %arg2: memref<1x2x256xf32, #tpu.memory_space<vmem>>, %arg3: memref<2x256xf32, #tpu.memory_space<vmem>>, %arg4: memref<1x4x512xf32, #tpu.memory_space<vmem>>, %arg5: memref<1x4x256xf32, #tpu.memory_space<vmem>>) attributes {dimension_semantics = [#tpu.dimension_semantics<parallel>, #tpu.dimension_semantics<parallel>], iteration_bounds = array<i64: 2, 1>, scalar_prefetch = 0 : i64, scratch_operands = 0 : i64, tpu.core_type = #tpu.core_type<tc>, window_params = [{transform_indices = @transform_0, window_bounds = array<i64: 1, 2, 256>}, {transform_indices = @transform_1, window_bounds = array<i64: 2, 256>}, {transform_indices = @transform_2, window_bounds = array<i64: 1, 4, 512>}, {transform_indices = @transform_3, window_bounds = array<i64: 1, 4, 256>}]} {
    %c0 = arith.constant 0 : index
    %c0_0 = arith.constant 0 : index
    %c0_1 = arith.constant 0 : index
    %0 = vector.load %arg2[%c0, %c0_0, %c0_1] : memref<1x2x256xf32, #tpu.memory_space<vmem>>, vector<1x1x256xf32>
    %1 = vector.shape_cast %0 : vector<1x1x256xf32> to vector<1x256xf32>
    %c0_2 = arith.constant 0 : index
    %c1 = arith.constant 1 : index
    %c0_3 = arith.constant 0 : index
    %2 = vector.load %arg2[%c0_2, %c1, %c0_3] : memref<1x2x256xf32, #tpu.memory_space<vmem>>, vector<1x1x256xf32>
    %3 = vector.shape_cast %2 : vector<1x1x256xf32> to vector<1x256xf32>
    %c0_4 = arith.constant 0 : index
    %c0_5 = arith.constant 0 : index
    %4 = vector.load %arg3[%c0_4, %c0_5] : memref<2x256xf32, #tpu.memory_space<vmem>>, vector<1x256xf32>
    %c1_6 = arith.constant 1 : index
    %c0_7 = arith.constant 0 : index
    %5 = vector.load %arg3[%c1_6, %c0_7] : memref<2x256xf32, #tpu.memory_space<vmem>>, vector<1x256xf32>
    %6 = arith.addf %1, %4 : vector<1x256xf32>
    %cst = arith.constant 1.000000e+00 : f32
    %7 = vector.broadcast %cst : f32 to vector<1x256xf32>
    %8 = arith.addf %6, %7 : vector<1x256xf32>
    %9 = arith.addf %3, %5 : vector<1x256xf32>
    %cst_8 = arith.constant 1.000000e+00 : f32
    %10 = vector.broadcast %cst_8 : f32 to vector<1x256xf32>
    %11 = arith.addf %9, %10 : vector<1x256xf32>
    %12 = math.floor %8 : vector<1x256xf32>
    %13 = math.floor %11 : vector<1x256xf32>
    %cst_9 = arith.constant 0.000000e+00 : f32
    %cst_10 = arith.constant 1.700000e+01 : f32
    %14 = vector.broadcast %cst_9 : f32 to vector<1x256xf32>
    %15 = arith.maximumf %14, %12 : vector<1x256xf32>
    %16 = vector.broadcast %cst_10 : f32 to vector<1x256xf32>
    %17 = arith.minimumf %16, %15 : vector<1x256xf32>
    %cst_11 = arith.constant 1.000000e+00 : f32
    %18 = vector.broadcast %cst_11 : f32 to vector<1x256xf32>
    %19 = arith.addf %12, %18 : vector<1x256xf32>
    %cst_12 = arith.constant 0.000000e+00 : f32
    %cst_13 = arith.constant 1.700000e+01 : f32
    %20 = vector.broadcast %cst_12 : f32 to vector<1x256xf32>
    %21 = arith.maximumf %20, %19 : vector<1x256xf32>
    %22 = vector.broadcast %cst_13 : f32 to vector<1x256xf32>
    %23 = arith.minimumf %22, %21 : vector<1x256xf32>
    %cst_14 = arith.constant 0.000000e+00 : f32
    %cst_15 = arith.constant 1.700000e+01 : f32
    %24 = vector.broadcast %cst_14 : f32 to vector<1x256xf32>
    %25 = arith.maximumf %24, %13 : vector<1x256xf32>
    %26 = vector.broadcast %cst_15 : f32 to vector<1x256xf32>
    %27 = arith.minimumf %26, %25 : vector<1x256xf32>
    %cst_16 = arith.constant 1.000000e+00 : f32
    %28 = vector.broadcast %cst_16 : f32 to vector<1x256xf32>
    %29 = arith.addf %13, %28 : vector<1x256xf32>
    %cst_17 = arith.constant 0.000000e+00 : f32
    %cst_18 = arith.constant 1.700000e+01 : f32
    %30 = vector.broadcast %cst_17 : f32 to vector<1x256xf32>
    %31 = arith.maximumf %30, %29 : vector<1x256xf32>
    %32 = vector.broadcast %cst_18 : f32 to vector<1x256xf32>
    %33 = arith.minimumf %32, %31 : vector<1x256xf32>
    %34 = arith.subf %23, %8 : vector<1x256xf32>
    %35 = arith.subf %33, %11 : vector<1x256xf32>
    %36 = arith.subf %23, %17 : vector<1x256xf32>
    %37 = arith.subf %33, %27 : vector<1x256xf32>
    %38 = arith.mulf %34, %35 : vector<1x256xf32>
    %cst_19 = arith.constant 1.000000e+00 : f32
    %39 = vector.broadcast %cst_19 : f32 to vector<1x256xf32>
    %40 = arith.subf %39, %35 : vector<1x256xf32>
    %41 = arith.mulf %34, %40 : vector<1x256xf32>
    %42 = arith.mulf %41, %37 : vector<1x256xf32>
    %cst_20 = arith.constant 1.000000e+00 : f32
    %43 = vector.broadcast %cst_20 : f32 to vector<1x256xf32>
    %44 = arith.subf %43, %34 : vector<1x256xf32>
    %45 = arith.mulf %44, %35 : vector<1x256xf32>
    %46 = arith.mulf %45, %36 : vector<1x256xf32>
    %cst_21 = arith.constant 1.000000e+00 : f32
    %47 = vector.broadcast %cst_21 : f32 to vector<1x256xf32>
    %48 = arith.subf %47, %34 : vector<1x256xf32>
    %cst_22 = arith.constant 1.000000e+00 : f32
    %49 = vector.broadcast %cst_22 : f32 to vector<1x256xf32>
    %50 = arith.subf %49, %35 : vector<1x256xf32>
    %51 = arith.mulf %48, %50 : vector<1x256xf32>
    %52 = arith.mulf %51, %36 : vector<1x256xf32>
    %53 = arith.mulf %52, %37 : vector<1x256xf32>
    %54 = arith.fptosi %27 : vector<1x256xf32> to vector<1x256xi32>
    %c18_i32 = arith.constant 18 : i32
    %55 = vector.broadcast %c18_i32 : i32 to vector<1x256xi32>
    %56 = arith.muli %54, %55 : vector<1x256xi32>
    %57 = arith.fptosi %17 : vector<1x256xf32> to vector<1x256xi32>
    %58 = arith.addi %56, %57 : vector<1x256xi32>
    %59 = tpu.iota {dimensions = array<i32: 0>} : vector<384x256xi32>
    %cst_23 = arith.constant 0.000000e+00 : f32
    %60 = vector.broadcast %cst_23 : f32 to vector<4x256xf32>
    %cst_24 = arith.constant 0.000000e+00 : f32
    %61 = vector.broadcast %cst_24 : f32 to vector<4x256xf32>
    %cst_25 = arith.constant 0.000000e+00 : f32
    %62 = vector.broadcast %cst_25 : f32 to vector<4x256xf32>
    %cst_26 = arith.constant 0.000000e+00 : f32
    %63 = vector.broadcast %cst_26 : f32 to vector<4x256xf32>
    %c0_i32 = arith.constant 0 : i32
    %64 = vector.broadcast %c0_i32 : i32 to vector<1x256xi32>
    %65 = arith.subi %58, %64 : vector<1x256xi32>
    %66 = vector.broadcast %65 : vector<1x256xi32> to vector<384x256xi32>
    %67 = arith.cmpi eq, %59, %66 : vector<384x256xi32>
    %cst_27 = arith.constant 1.000000e+00 : f32
    %cst_28 = arith.constant 0.000000e+00 : f32
    %68 = vector.broadcast %cst_27 : f32 to vector<384x256xf32>
    %69 = vector.broadcast %cst_28 : f32 to vector<384x256xf32>
    %70 = arith.select %67, %68, %69 : vector<384x256xi1>, vector<384x256xf32>
    %c0_29 = arith.constant 0 : index
    %c0_30 = arith.constant 0 : index
    %c0_31 = arith.constant 0 : index
    %71 = vector.load %arg4[%c0_29, %c0_30, %c0_31] : memref<1x4x512xf32, #tpu.memory_space<vmem>>, vector<1x4x512xf32>
    %72 = vector.shape_cast %71 : vector<1x4x512xf32> to vector<4x512xf32>
    %73 = vector.extract_strided_slice %72 {offsets = [0, 0], sizes = [4, 384], strides = [1, 1]} : vector<4x512xf32> to vector<4x384xf32>
    %74 = vector.extract_strided_slice %72 {offsets = [0, 1], sizes = [4, 384], strides = [1, 1]} : vector<4x512xf32> to vector<4x384xf32>
    %75 = vector.extract_strided_slice %72 {offsets = [0, 18], sizes = [4, 384], strides = [1, 1]} : vector<4x512xf32> to vector<4x384xf32>
    %76 = vector.extract_strided_slice %72 {offsets = [0, 19], sizes = [4, 384], strides = [1, 1]} : vector<4x512xf32> to vector<4x384xf32>
    %cst_32 = arith.constant dense<0.000000e+00> : vector<4x256xf32>
    %77 = tpu.matmul %73, %70, %cst_32 {dimension_numbers = #tpu.dot_dimension_numbers<[1], [0], [0], [1], [0, 0, 1, 1], [], []>} : vector<4x384xf32>, vector<384x256xf32>, vector<4x256xf32> -> vector<4x256xf32>
    %78 = arith.addf %60, %77 : vector<4x256xf32>
    %cst_33 = arith.constant dense<0.000000e+00> : vector<4x256xf32>
    %79 = tpu.matmul %75, %70, %cst_33 {dimension_numbers = #tpu.dot_dimension_numbers<[1], [0], [0], [1], [0, 0, 1, 1], [], []>} : vector<4x384xf32>, vector<384x256xf32>, vector<4x256xf32> -> vector<4x256xf32>
    %80 = arith.addf %61, %79 : vector<4x256xf32>
    %cst_34 = arith.constant dense<0.000000e+00> : vector<4x256xf32>
    %81 = tpu.matmul %74, %70, %cst_34 {dimension_numbers = #tpu.dot_dimension_numbers<[1], [0], [0], [1], [0, 0, 1, 1], [], []>} : vector<4x384xf32>, vector<384x256xf32>, vector<4x256xf32> -> vector<4x256xf32>
    %82 = arith.addf %62, %81 : vector<4x256xf32>
    %cst_35 = arith.constant dense<0.000000e+00> : vector<4x256xf32>
    %83 = tpu.matmul %76, %70, %cst_35 {dimension_numbers = #tpu.dot_dimension_numbers<[1], [0], [0], [1], [0, 0, 1, 1], [], []>} : vector<4x384xf32>, vector<384x256xf32>, vector<4x256xf32> -> vector<4x256xf32>
    %84 = arith.addf %63, %83 : vector<4x256xf32>
    %85 = vector.broadcast %38 : vector<1x256xf32> to vector<4x256xf32>
    %86 = arith.mulf %85, %78 : vector<4x256xf32>
    %87 = vector.broadcast %42 : vector<1x256xf32> to vector<4x256xf32>
    %88 = arith.mulf %87, %80 : vector<4x256xf32>
    %89 = arith.addf %86, %88 : vector<4x256xf32>
    %90 = vector.broadcast %46 : vector<1x256xf32> to vector<4x256xf32>
    %91 = arith.mulf %90, %82 : vector<4x256xf32>
    %92 = arith.addf %89, %91 : vector<4x256xf32>
    %93 = vector.broadcast %53 : vector<1x256xf32> to vector<4x256xf32>
    %94 = arith.mulf %93, %84 : vector<4x256xf32>
    %95 = arith.addf %92, %94 : vector<4x256xf32>
    %c0_36 = arith.constant 0 : index
    %c0_37 = arith.constant 0 : index
    %c0_38 = arith.constant 0 : index
    %96 = vector.load %arg5[%c0_36, %c0_37, %c0_38] : memref<1x4x256xf32, #tpu.memory_space<vmem>>, vector<1x4x256xf32>
    %97 = vector.shape_cast %96 : vector<1x4x256xf32> to vector<4x256xf32>
    %98 = vector.shape_cast %95 : vector<4x256xf32> to vector<1x4x256xf32>
    tpu.vector_store %arg5[%c0_36, %c0_37, %c0_38], %98 {strides = array<i32>} : memref<1x4x256xf32, #tpu.memory_space<vmem>>, vector<1x4x256xf32>,
    return
  }
  func.func @transform_0(%arg0: i32, %arg1: i32) -> (i32, i32, i32) {
    %c0_i32 = arith.constant 0 : i32
    %c0_i32_0 = arith.constant 0 : i32
    return %arg0, %c0_i32, %arg1 : i32, i32, i32
  }
  func.func @transform_1(%arg0: i32, %arg1: i32) -> (i32, i32) {
    %c0_i32 = arith.constant 0 : i32
    %c0_i32_0 = arith.constant 0 : i32
    return %c0_i32, %arg1 : i32, i32
  }
  func.func @transform_2(%arg0: i32, %arg1: i32) -> (i32, i32, i32) {
    %c0_i32 = arith.constant 0 : i32
    %c0_i32_0 = arith.constant 0 : i32
    %c0_i32_1 = arith.constant 0 : i32
    return %arg0, %c0_i32, %c0_i32_0 : i32, i32, i32
  }
  func.func @transform_3(%arg0: i32, %arg1: i32) -> (i32, i32, i32) {
    %c0_i32 = arith.constant 0 : i32
    %c0_i32_0 = arith.constant 0 : i32
    return %arg0, %c0_i32, %arg1 : i32, i32, i32
  }
}

</mosaic_0001>

<bundles_post_ra>
// kernel: spatial_transformer.1
= control target key start
LH: loop header
LB: loop body
LE: loop exit
PB: predicated region body
PF: predicated region fallthrough
CT: control target
= control target key end

     0   :  { %s1752_s12 = smov 0   ;;  %s1754_s13 = smov 0   ;;  %s3751_s0 = inlined_call_operand.vmem [shape: f32[2,2,256], index: 0, kind: input, shape index: {}]   ;;  %s3752_s1 = inlined_call_operand.vmem [shape: f32[2,256], index: 1, kind: input, shape index: {}]   ;;  %s3753_s2 = inlined_call_operand.vmem [shape: f32[2,4,512], index: 2, kind: input, shape index: {}]   ;;  %s3754_s3 = inlined_call_operand.vmem [shape: f32[2,4,256], index: 3, kind: output, shape index: {}]  }
   0x1   :  { %s1756_s14 = smov 0  }
   0x2 LB: > { %s25_s15 = sadd.s32 1, %s1722_s13  ;;  %p1254_p0 = scmp.ge.s32.totalorder %s1726_s14, 1  ;;  %s1726_s14 = sphi %s1756_s14, %s13_s14   ;;  %s1722_s13 = sphi %s1754_s13, %s4093_s13   ;;  %s1718_s12 = sphi %s1752_s12, %s4092_s12  }
   0x3   : > { %p27_p1 = scmp.ge.s32.totalorder %s25_s15, 2  ;;  %p179_p2 = scmp.lt.s32.totalorder %s1726_s14, 3 }
   0x5   : > { %s4095_s15 = smov (%p27_p1, %s25_s15), 0  ;;  %p180_p3 = pnand %p1254_p0, %p179_p2 }
   0x6   : > { %p222_p4 = scmp.lt.s32.totalorder (!%p180_p3), %s1718_s12, 1  ;;  %s1728_s28 = smov (!%p180_p3), 110  }
   0x7   : > { %183 = sbr.rel (%p180_p3) target bundleno = 403 (0x193), region = 32  ;;  %s1730_s29 = smov (!%p180_p3), 127  }
   0x8   : > { %s1731_s30 = smov (!%p180_p3), 109  }
   0xc   : > { %s4097_s12 = smov (!%p222_p4, %s1718_s12), 1  ;;  %v255_v0 = vld [vmem:[%s3752_s1] ss:$2 sm:$0x3]  ;;  %v292_v18 = vlaneseq  ;;  %v1729_v39 = vmov 1.0  }
   0xd   : > { %s1650_s16 = sshll.u32 %s4097_s12, 4  ;;  %s1649_s19 = sshll.u32 %s4097_s12, 2  ;;  %v1262_v1 = vld [vmem:[%s3752_s1 + $0x1] ss:$2 sm:$0x3] }
   0xe   : > { %s241_s22 = scalar_lea.vmem %s3753_s2, %s1650_s16  ;;  %s229_s27 = scalar_lea.vmem %s3751_s0, %s1649_s19  ;;  %v1820_v22 = vshrl.u32 %v292_v18, 7 }
   0xf   : > { %v1786_v2 = vld [vmem:[%s241_s22] sm:$0xff]  ;;  %v1788_v3 = vld [vmem:[%s241_s22 + $0x8] sm:$0xff]  ;;  %s1651_s4 = sshll.u32 %s4097_s12, 3 }
  0x10   : > { %v252_v4 = vld [vmem:[%s229_s27] ss:$2 sm:$0x3]  ;;  %539 = vst [vmem:[#allocation1] ss:$2 sm:$0xff] %v1786_v2  ;;  %v1826_v30 = vadd.s32 120, %v1820_v22  ;;  %s250_s7 = scalar_lea.vmem %s3754_s3, %s1651_s4 }
  0x11   : > { %v1261_v5 = vld [vmem:[%s229_s27 + $0x1] ss:$2 sm:$0x3]  ;;  %v258_v6 = vadd.f32 %v255_v0, %v252_v4  ;;  %541 = vst [vmem:[#allocation1 + $0x10] ss:$2 sm:$0xff] %v1788_v3  ;;  %v1830_v31 = vadd.s32 112, %v1820_v22 }
  0x12   : > { %v260_v7 = vadd.f32 %v1262_v1, %v1261_v5  ;;  %v1833_v32 = vadd.s32 248, %v1820_v22  ;;  %v1836_v33 = vadd.s32 240, %v1820_v22  ;;  %v1841_v35 = vadd.s32 104, %v1820_v22 }
  0x13   : > { %v1792_v8 = vadd.f32 1.0, %v258_v6  ;;  %v1844_v36 = vadd.s32 232, %v1820_v22  ;;  %v1847_v37 = vadd.s32 96, %v1820_v22  ;;  %v1856_v38 = vadd.s32 224, %v1820_v22 }
  0x14   : > { %v1794_v9 = vadd.f32 1.0, %v260_v7  ;;  %v1869_v40 = vadd.s32 88, %v1820_v22  ;;  %v1872_v41 = vadd.s32 376, %v1820_v22  ;;  %v1879_v42 = vadd.s32 216, %v1820_v22 }
  0x15   : > { %v262_v10 = vfloor.f32 %v1792_v8  ;;  %v1882_v43 = vadd.s32 368, %v1820_v22  ;;  %v1893_v44 = vadd.s32 80, %v1820_v22  ;;  %v1896_v45 = vadd.s32 208, %v1820_v22 }
  0x16   : > { %v263_v11 = vfloor.f32 %v1794_v9  ;;  %v1899_v46 = vadd.s32 360, %v1820_v22  ;;  %v1917_v50 = vadd.s32 72, %v1820_v22  ;;  %v1923_v51 = vadd.s32 352, %v1820_v22 }
  0x17   : > { %v1800_v12 = vmax.f32 %v262_v10, 0.0  ;;  %v1802_v13 = vld.sshfl [vmem:[#allocation1] sm:$0xff pattern:$0x75316420]  ;;  %v1930_v52 = vadd.s32 200, %v1820_v22  ;;  %v1947_v53 = vadd.s32 64, %v1820_v22 }
  0x18   : > { %v1804_v14 = vld.sshfl [vmem:[#allocation1 + $0x8] sm:$0xff pattern:$0x75316420]  ;;  %v1806_v15 = vld.sshfl [vmem:[#allocation1 + $0x10] sm:$0xff pattern:$0x75316420] }
  0x19   : > { %668 = vst [vmem:[#allocation1] ss:$2 sm:$0xff] %v1786_v2  ;;  %v1812_v16 = vmax.f32 %v263_v11, 0.0  ;;  %v3811_v17 = vmin.f32 %v1800_v12, 17.0  ;;  %v1952_v54 = vadd.s32 344, %v1820_v22  ;;  %v1959_v55 = vadd.s32 192, %v1820_v22 }
  0x1a   : > { %670 = vst [vmem:[#allocation1 + $0x10] ss:$2 sm:$0xff] %v1788_v3  ;;  %v1978_v57 = vadd.s32 336, %v1820_v22  ;;  %v1985_v58 = vadd.s32 56, %v1820_v22  ;;  %v1988_v59 = vadd.s32 184, %v1820_v22  ;;  %v2008_v60 = vadd.s32 328, %v1820_v22 }
  0x1b   : > { %v270_v19 = vmin.f32 %v1812_v16, 17.0  ;;  %v1655_v21 = vcvt.f32.s32 %v3811_v17  ;;  %v2015_v61 = vadd.s32 48, %v1820_v22  ;;  %v2018_v62 = vadd.s32 176, %v1820_v22 }
  0x1c   : > { %v2041_v63 = vadd.s32 320, %v1820_v22  ;;  %v2048_v0 = vadd.s32 40, %v1820_v22  ;;  %v2051_v1 = vadd.s32 168, %v1820_v22  ;;  %v2081_v4 = vadd.s32 32, %v1820_v22 }
  0x1d   : > { %v1653_v20 = vcvt.f32.s32 %v270_v19  ;;  %v2084_v5 = vadd.s32 160, %v1820_v22  ;;  %v2103_v6 = vadd.s32 24, %v1820_v22  ;;  %v2110_v7 = vadd.s32 304, %v1820_v22 }
  0x1e   : > { %v2117_v18 = vadd.s32 16, %v1820_v22 }
  0x1f   : > { %v289_v26 = vmul.u32 18, %v1653_v20  ;;  %v2120_v20 = vadd.s32 152, %v1820_v22 }
  0x20   : > { %v671_v23 = vld.sshfl [vmem:[#allocation1] sm:$0xff pattern:$0x75316420]  ;;  %v672_v24 = vld.sshfl [vmem:[#allocation1 + $0x8] sm:$0xff pattern:$0x75316420] }
  0x21   : > { %v1684_v25 = vpack.i.bf16 %v672_v24, %v671_v23  ;;  %810 = vst [vmem:[#allocation1] ss:$2 sm:$0xff] %v1786_v2  ;;  %v674_v27 = vld.sshfl [vmem:[#allocation1 + $0x18] sm:$0xff pattern:$0x75316420]  ;;  %v291_v29 = vadd.s32 %v1655_v21, %v289_v26  ;;  %v2139_v21 = vadd.s32 144, %v1820_v22 }
  0x22   : > { %681 = vrot.lane.b32.xlu1 %v674_v27, %s1728_s28  ;;  %v673_v28 = vld.sshfl [vmem:[#allocation1 + $0x10] sm:$0xff pattern:$0x75316420]  ;;  %v2146_v23 = vadd.s32 296, %v1820_v22  ;;  %v2177_v26 = vadd.s32 288, %v1820_v22  ;;  %v2185_v27 = vadd.s32 8, %v1820_v22 }
  0x23   : > { %1685 = vrot.lane.b32.xlu0 %v1684_v25, %s1728_s28  ;;  %812 = vst [vmem:[#allocation1 + $0x10] ss:$2 sm:$0xff] %v1788_v3  ;;  %v1838_v34 = vperm.slane %v291_v29, 0  ;;  %v1906_v49 = vperm.slane %v291_v29, 1  ;;  %v2218_v29 = vadd.s32 128, %v1820_v22 }
  0x25   : > { %vm3815_vm0 = vcmp.eq.s32.totalorder %v1826_v30, %v1838_v34  ;;  %vm3819_vm1 = vcmp.eq.s32.totalorder %v1830_v31, %v1838_v34  ;;  %vm405_vm2 = vcmp.eq.s32.totalorder %v1833_v32, %v1838_v34  ;;  %vm3788_vm3 = vcmp.eq.s32.totalorder %v1836_v33, %v1838_v34 }
  0x26   : > { %1263 = vmatpush.msk.msra.mxu0 %vm3815_vm0, %v1729_v39  ;;  %1279 = vmatpush.msk.msra.mxu1 %vm405_vm2, %v1729_v39  ;;  %vm3823_vm4 = vcmp.eq.s32.totalorder %v1841_v35, %v1838_v34  ;;  %vm3759_vm5 = vcmp.eq.s32.totalorder %v1844_v36, %v1838_v34  ;;  %vm3825_vm6 = vcmp.eq.s32.totalorder %v1847_v37, %v1838_v34 }
  0x27   : > { %vm3757_vm7 = vcmp.eq.s32.totalorder %v1856_v38, %v1838_v34  ;;  %vm3755_vm8 = vcmp.eq.s32.totalorder %v1872_v41, %v1838_v34  ;;  %vm3826_vm9 = vcmp.eq.s32.totalorder %v1869_v40, %v1838_v34  ;;  %vm3758_vm10 = vcmp.eq.s32.totalorder %v1879_v42, %v1838_v34 }
  0x28   : > { %1264 = vmatpush.msk.msra.mxu0 %vm3819_vm1, %v1729_v39  ;;  %1280 = vmatpush.msk.msra.mxu1 %vm3788_vm3, %v1729_v39  ;;  %vm3756_vm11 = vcmp.eq.s32.totalorder %v1882_v43, %v1838_v34  ;;  %vm3760_vm12 = vcmp.eq.s32.totalorder %v1899_v46, %v1838_v34  ;;  %vm3761_vm13 = vcmp.eq.s32.totalorder %v1893_v44, %v1838_v34  ;;  %v2160_v24 = vld.sshfl [vmem:[#allocation1] sm:$0xff pattern:$0x75316420]  ;;  %v2162_v25 = vld.sshfl [vmem:[#allocation1 + $0x8] sm:$0xff pattern:$0x75316420] }
  0x29   : > { %1295 = vmatpush.msk.msra.mxu2 %vm3755_vm8, %v1729_v39  ;;  %vm3762_vm14 = vcmp.eq.s32.totalorder %v1896_v45, %v1838_v34  ;;  %vm3763_vm15 = vcmp.eq.s32.totalorder %v1923_v51, %v1838_v34  ;;  %vm3764_vm8 = vcmp.eq.s32.totalorder %v1826_v30, %v1906_v49  ;;  %952 = vst [vmem:[#allocation1] ss:$2 sm:$0xff] %v1786_v2  ;;  %v2211_v2 = vadd.s32 280, %v1820_v22 }
  0x2a   : > { %v815_v47 = vld.sshfl [vmem:[#allocation1 + $0x10] sm:$0xff pattern:$0x75316420]  ;;  %v816_v48 = vld.sshfl [vmem:[#allocation1 + $0x18] sm:$0xff pattern:$0x75316420]  ;;  %1265 = vmatpush.msk.msra.mxu0 %vm3823_vm4, %v1729_v39  ;;  %1281 = vmatpush.msk.msra.mxu1 %vm3759_vm5, %v1729_v39  ;;  %vm3768_vm5 = vcmp.eq.s32.totalorder %v1830_v31, %v1906_v49  ;;  %vm3802_vm3 = vcmp.eq.s32.totalorder %v2185_v27, %v1838_v34  ;;  %v1694_v17 = vpack.i.bf16 %v2162_v25, %v2160_v24 }
  0x2b   : > { %679 = vrot.lane.b32.xlu0 %v673_v28, %s1728_s28  ;;  %954 = vst [vmem:[#allocation1 + $0x10] ss:$2 sm:$0xff] %v1788_v3  ;;  %1296 = vmatpush.msk.msra.mxu2 %vm3756_vm11, %v1729_v39  ;;  %v1689_v56 = vpack.i.bf16 %v816_v48, %v815_v47  ;;  %vm3765_vm11 = vcmp.eq.s32.totalorder %v1917_v50, %v1838_v34  ;;  %v2074_v3 = vadd.s32 312, %v1820_v22  ;;  %v2188_v28 = vadd.s32 136, %v1820_v22 }
  0x2c   : > { %1266 = vmatpush.msk.msra.mxu0 %vm3825_vm6, %v1729_v39  ;;  %1282 = vmatpush.msk.msra.mxu1 %vm3757_vm7, %v1729_v39  ;;  %vm3766_vm7 = vcmp.eq.s32.totalorder %v1930_v52, %v1838_v34  ;;  %v2253_v47 = vadd.s32 272, %v1820_v22  ;;  %v2280_v48 = vadd.s32 264, %v1820_v22 }
  0x2d   : > { %1297 = vmatpush.msk.msra.mxu2 %vm3760_vm12, %v1729_v39  ;;  %1690 = vrot.lane.b32.xlu1 %v1689_v56, %s1730_s29  ;;  %vm3769_vm12 = vcmp.eq.s32.totalorder %v1947_v53, %v1838_v34  ;;  %v2307_v56 = vadd.s32 256, %v1820_v22 }
  0x2e   : > { %1267 = vmatpush.msk.msra.mxu0 %vm3826_vm9, %v1729_v39  ;;  %1283 = vmatpush.msk.msra.mxu1 %vm3758_vm10, %v1729_v39  ;;  %vm3767_vm10 = vcmp.eq.s32.totalorder %v1952_v54, %v1838_v34 }
  0x2f   : > { %1298 = vmatpush.msk.msra.mxu2 %vm3763_vm15, %v1729_v39  ;;  %1311 = vmatpush.msk.msra.mxu3 %vm3764_vm8, %v1729_v39  ;;  %vm3772_vm15 = vcmp.eq.s32.totalorder %v1841_v35, %v1906_v49  ;;  %vm3773_vm8 = vcmp.eq.s32.totalorder %v1985_v58, %v1838_v34 }
  0x30   : > { %1268 = vmatpush.msk.msra.mxu0 %vm3761_vm13, %v1729_v39  ;;  %1284 = vmatpush.msk.msra.mxu1 %vm3762_vm14, %v1729_v39  ;;  %vm3771_vm13 = vcmp.eq.s32.totalorder %v1959_v55, %v1838_v34  ;;  %vm3770_vm14 = vcmp.eq.s32.totalorder %v1978_v57, %v1838_v34  ;;  %v955_v25 = vld.sshfl [vmem:[#allocation1] sm:$0xff pattern:$0x75316420] }
  0x31   : > { %1299 = vmatpush.msk.msra.mxu2 %vm3767_vm10, %v1729_v39  ;;  %1312 = vmatpush.msk.msra.mxu3 %vm3768_vm5, %v1729_v39  ;;  %vm3776_vm10 = vcmp.eq.s32.totalorder %v1847_v37, %v1906_v49  ;;  %vm3777_vm5 = vcmp.eq.s32.totalorder %v2015_v61, %v1838_v34 }
  0x32   : > { %1269 = vmatpush.msk.msra.mxu0 %vm3765_vm11, %v1729_v39  ;;  %1285 = vmatpush.msk.msra.mxu1 %vm3766_vm7, %v1729_v39  ;;  %vm3775_vm11 = vcmp.eq.s32.totalorder %v1988_v59, %v1838_v34  ;;  %vm3774_vm7 = vcmp.eq.s32.totalorder %v2008_v60, %v1838_v34  ;;  %v958_v24 = vld.sshfl [vmem:[#allocation1 + $0x18] sm:$0xff pattern:$0x75316420] }
  0x33   : > { %1300 = vmatpush.msk.msra.mxu2 %vm3770_vm14, %v1729_v39  ;;  %1313 = vmatpush.msk.msra.mxu3 %vm3772_vm15, %v1729_v39  ;;  %vm3778_vm14 = vcmp.eq.s32.totalorder %v2041_v63, %v1838_v34  ;;  %vm3781_vm15 = vcmp.eq.s32.totalorder %v2048_v0, %v1838_v34 }
  0x34   : > { %1270 = vmatpush.msk.msra.mxu0 %vm3769_vm12, %v1729_v39  ;;  %1286 = vmatpush.msk.msra.mxu1 %vm3771_vm13, %v1729_v39  ;;  %vm3780_vm12 = vcmp.eq.s32.totalorder %v2018_v62, %v1838_v34  ;;  %vm3779_vm13 = vcmp.eq.s32.totalorder %v1869_v40, %v1906_v49 }
  0x35   : > { %1301 = vmatpush.msk.msra.mxu2 %vm3774_vm7, %v1729_v39  ;;  %1314 = vmatpush.msk.msra.mxu3 %vm3776_vm10, %v1729_v39  ;;  %vm3783_vm7 = vcmp.eq.s32.totalorder %v2074_v3, %v1838_v34  ;;  %vm3785_vm10 = vcmp.eq.s32.totalorder %v2081_v4, %v1838_v34 }
  0x36   : > { %1271 = vmatpush.msk.msra.mxu0 %vm3773_vm8, %v1729_v39  ;;  %1287 = vmatpush.msk.msra.mxu1 %vm3775_vm11, %v1729_v39  ;;  %vm3782_vm8 = vcmp.eq.s32.totalorder %v2051_v1, %v1838_v34  ;;  %vm3784_vm11 = vcmp.eq.s32.totalorder %v1893_v44, %v1906_v49 }
  0x37   : > { %1302 = vmatpush.msk.msra.mxu2 %vm3778_vm14, %v1729_v39  ;;  %1315 = vmatpush.msk.msra.mxu3 %vm3779_vm13, %v1729_v39  ;;  %vm3787_vm14 = vcmp.eq.s32.totalorder %v2110_v7, %v1838_v34  ;;  %vm3789_vm13 = vcmp.eq.s32.totalorder %v1917_v50, %v1906_v49 }
  0x38   : > { %1272 = vmatpush.msk.msra.mxu0 %vm3777_vm5, %v1729_v39  ;;  %1288 = vmatpush.msk.msra.mxu1 %vm3780_vm12, %v1729_v39  ;;  %vm3786_vm5 = vcmp.eq.s32.totalorder %v2084_v5, %v1838_v34  ;;  %vm3793_vm12 = vcmp.eq.s32.totalorder %v2103_v6, %v1838_v34 }
  0x39   : > { %1303 = vmatpush.msk.msra.mxu2 %vm3783_vm7, %v1729_v39  ;;  %1316 = vmatpush.msk.msra.mxu3 %vm3784_vm11, %v1729_v39  ;;  %vm3792_vm7 = vcmp.eq.s32.totalorder %v1947_v53, %v1906_v49  ;;  %vm3803_vm11 = vcmp.eq.s32.totalorder %v2117_v18, %v1838_v34 }
  0x3a   : > { %1273 = vmatpush.msk.msra.mxu0 %vm3781_vm15, %v1729_v39  ;;  %1289 = vmatpush.msk.msra.mxu1 %vm3782_vm8, %v1729_v39  ;;  %vm3791_vm15 = vcmp.eq.s32.totalorder %v2120_v20, %v1838_v34  ;;  %vm3790_vm8 = vcmp.eq.s32.totalorder %v2146_v23, %v1838_v34 }
  0x3b   : > { %1304 = vmatpush.msk.msra.mxu2 %vm3787_vm14, %v1729_v39  ;;  %1317 = vmatpush.msk.msra.mxu3 %vm3789_vm13, %v1729_v39  ;;  %vm3796_vm14 = vcmp.eq.s32.totalorder %v1985_v58, %v1906_v49  ;;  %vm3797_vm13 = vcmp.eq.s32.totalorder %v2188_v28, %v1838_v34 }
  0x3c   : > { %1274 = vmatpush.msk.msra.mxu0 %vm3785_vm10, %v1729_v39  ;;  %1290 = vmatpush.msk.msra.mxu1 %vm3786_vm5, %v1729_v39  ;;  %vm3795_vm10 = vcmp.eq.s32.totalorder %v2139_v21, %v1838_v34  ;;  %vm3794_vm5 = vcmp.eq.s32.totalorder %v2177_v26, %v1838_v34 }
  0x3d   : > { %1305 = vmatpush.msk.msra.mxu2 %vm3790_vm8, %v1729_v39  ;;  %1318 = vmatpush.msk.msra.mxu3 %vm3792_vm7, %v1729_v39  ;;  %vm3798_vm8 = vcmp.eq.s32.totalorder %v2211_v2, %v1838_v34  ;;  %vm3800_vm7 = vcmp.eq.s32.totalorder %v1820_v22, %v1838_v34 }
  0x3e   : > { %1275 = vmatpush.msk.msra.mxu0 %vm3793_vm12, %v1729_v39  ;;  %1291 = vmatpush.msk.msra.mxu1 %vm3791_vm15, %v1729_v39  ;;  %vm3799_vm15 = vcmp.eq.s32.totalorder %v2015_v61, %v1906_v49  ;;  %vm3801_vm12 = vcmp.eq.s32.totalorder %v2218_v29, %v1838_v34 }
  0x3f   : > { %1306 = vmatpush.msk.msra.mxu2 %vm3794_vm5, %v1729_v39  ;;  %1319 = vmatpush.msk.msra.mxu3 %vm3796_vm14, %v1729_v39  ;;  %vm3806_vm5 = vcmp.eq.s32.totalorder %v1833_v32, %v1906_v49  ;;  %vm3805_vm14 = vcmp.eq.s32.totalorder %v2253_v47, %v1838_v34 }
  0x40   : > { %1276 = vmatpush.msk.msra.mxu0 %vm3803_vm11, %v1729_v39  ;;  %1292 = vmatpush.msk.msra.mxu1 %vm3795_vm10, %v1729_v39  ;;  %vm3804_vm10 = vcmp.eq.s32.totalorder %v1872_v41, %v1906_v49  ;;  %vm3813_vm11 = vcmp.eq.s32.totalorder %v1899_v46, %v1906_v49 }
  0x41   : > { %1307 = vmatpush.msk.msra.mxu2 %vm3798_vm8, %v1729_v39  ;;  %1320 = vmatpush.msk.msra.mxu3 %vm3799_vm15, %v1729_v39  ;;  %vm3810_vm8 = vcmp.eq.s32.totalorder %v1836_v33, %v1906_v49  ;;  %vm3808_vm15 = vcmp.eq.s32.totalorder %v1882_v43, %v1906_v49 }
  0x42   : > { %1277 = vmatpush.msk.msra.mxu0 %vm3802_vm3, %v1729_v39  ;;  %1293 = vmatpush.msk.msra.mxu1 %vm3797_vm13, %v1729_v39  ;;  %vm3807_vm13 = vcmp.eq.s32.totalorder %v2048_v0, %v1906_v49  ;;  %vm402_vm3 = vcmp.eq.s32.totalorder %v1844_v36, %v1906_v49 }
  0x43   : > { %1308 = vmatpush.msk.msra.mxu2 %vm3805_vm14, %v1729_v39  ;;  %1321 = vmatpush.msk.msra.mxu3 %vm3807_vm13, %v1729_v39  ;;  %vm3816_vm14 = vcmp.eq.s32.totalorder %v2103_v6, %v1906_v49  ;;  %vm3814_vm13 = vcmp.eq.s32.totalorder %v1923_v51, %v1906_v49 }
  0x44   : > { %1278 = vmatpush.msk.msra.mxu0 %vm3800_vm7, %v1729_v39  ;;  %1294 = vmatpush.msk.msra.mxu1 %vm3801_vm12, %v1729_v39  ;;  %vm3809_vm7 = vcmp.eq.s32.totalorder %v2280_v48, %v1838_v34  ;;  %vm352_vm12 = vcmp.eq.s32.totalorder %v2081_v4, %v1906_v49 }
  0x45   : > { %1309 = vmatpush.msk.msra.mxu2 %vm3809_vm7, %v1729_v39  ;;  %1322 = vmatpush.msk.msra.mxu3 %vm352_vm12, %v1729_v39  ;;  %vm398_vm7 = vcmp.eq.s32.totalorder %v1879_v42, %v1906_v49 }
  0x46   : > { %1327 = vmatpush.msk.msrb.mxu0 %vm3806_vm5, %v1729_v39  ;;  %1343 = vmatpush.msk.msrb.mxu1 %vm3804_vm10, %v1729_v39  ;;  %vm3812_vm10 = vcmp.eq.s32.totalorder %v2307_v56, %v1838_v34  ;;  %vm400_vm5 = vcmp.eq.s32.totalorder %v1856_v38, %v1906_v49 }
  0x47   : > { %1310 = vmatpush.msk.msra.mxu2 %vm3812_vm10, %v1729_v39  ;;  %1323 = vmatpush.msk.msra.mxu3 %vm3816_vm14, %v1729_v39  ;;  %vm396_vm10 = vcmp.eq.s32.totalorder %v1896_v45, %v1906_v49  ;;  %vm3822_vm14 = vcmp.eq.s32.totalorder %v2008_v60, %v1906_v49 }
  0x48   : > { %1328 = vmatpush.msk.msrb.mxu0 %vm3810_vm8, %v1729_v39  ;;  %1344 = vmatpush.msk.msrb.mxu1 %vm3808_vm15, %v1729_v39  ;;  %vm3818_vm15 = vcmp.eq.s32.totalorder %v2117_v18, %v1906_v49  ;;  %vm3817_vm8 = vcmp.eq.s32.totalorder %v1952_v54, %v1906_v49 }
  0x49   : > { %1359 = vmatpush.msk.msrb.mxu2 %vm3815_vm0, %v1729_v39  ;;  %1324 = vmatpush.msk.msra.mxu3 %vm3818_vm15, %v1729_v39  ;;  %vm394_vm0 = vcmp.eq.s32.totalorder %v1930_v52, %v1906_v49  ;;  %vm392_vm15 = vcmp.eq.s32.totalorder %v1959_v55, %v1906_v49 }
  0x4a   : > { %1329 = vmatpush.msk.msrb.mxu0 %vm402_vm3, %v1729_v39  ;;  %1345 = vmatpush.msk.msrb.mxu1 %vm3813_vm11, %v1729_v39  ;;  %vm3820_vm11 = vcmp.eq.s32.totalorder %v1978_v57, %v1906_v49 }
  0x4b   : > { %1360 = vmatpush.msk.msrb.mxu2 %vm3819_vm1, %v1729_v39  ;;  %1695 = vrot.lane.b32.xlu2 %v1694_v17, %s1730_s29  ;;  %vm3824_vm1 = vcmp.eq.s32.totalorder %v2041_v63, %v1906_v49  ;;  %v957_v17 = vld.sshfl [vmem:[#allocation1 + $0x10] sm:$0xff pattern:$0x75316420] }
  0x4c   : > { %1330 = vmatpush.msk.msrb.mxu0 %vm400_vm5, %v1729_v39  ;;  %1346 = vmatpush.msk.msrb.mxu1 %vm3814_vm13, %v1729_v39  ;;  %vm3821_vm13 = vcmp.eq.s32.totalorder %v2185_v27, %v1906_v49 }
  0x4d   : > { %1325 = vmatpush.msk.msra.mxu3 %vm3821_vm13, %v1729_v39  ;;  %1361 = vmatpush.msk.msrb.mxu2 %vm3823_vm4, %v1729_v39  ;;  %vm3828_vm13 = vcmp.eq.s32.totalorder %v2074_v3, %v1906_v49  ;;  %vm3829_vm4 = vcmp.eq.s32.totalorder %v2110_v7, %v1906_v49 }
  0x4e   : > { %1331 = vmatpush.msk.msrb.mxu0 %vm398_vm7, %v1729_v39  ;;  %1347 = vmatpush.msk.msrb.mxu1 %vm3817_vm8, %v1729_v39  ;;  %vm344_vm8 = vcmp.eq.s32.totalorder %v1820_v22, %v1906_v49 }
  0x4f   : > { %1326 = vmatpush.msk.msra.mxu3 %vm344_vm8, %v1729_v39  ;;  %1362 = vmatpush.msk.msrb.mxu2 %vm3825_vm6, %v1729_v39  ;;  %vm3832_vm6 = vcmp.eq.s32.totalorder %v2146_v23, %v1906_v49 }
  0x50   : > { %1332 = vmatpush.msk.msrb.mxu0 %vm396_vm10, %v1729_v39  ;;  %1348 = vmatpush.msk.msrb.mxu1 %vm3820_vm11, %v1729_v39  ;;  %vm3827_vm11 = vcmp.eq.s32.totalorder %v1988_v59, %v1906_v49 }
  0x51   : > { %1375 = vmatpush.msk.msrb.mxu3 %vm405_vm2, %v1729_v39  ;;  %1363 = vmatpush.msk.msrb.mxu2 %vm3826_vm9, %v1729_v39  ;;  %vm3841_vm9 = vcmp.eq.s32.totalorder %v1836_v33, %v1838_v34 }
  0x52   : > { %1333 = vmatpush.msk.msrb.mxu0 %vm394_vm0, %v1729_v39  ;;  %1349 = vmatpush.msk.msrb.mxu1 %vm3822_vm14, %v1729_v39  ;;  %vm3830_vm14 = vcmp.eq.s32.totalorder %v2018_v62, %v1906_v49 }
  0x53   : > { %1376 = vmatpush.msk.msrb.mxu3 %vm3841_vm9, %v1729_v39  ;;  %vm3833_vm9 = vcmp.eq.s32.totalorder %v2177_v26, %v1906_v49  ;;  %564 = vmatmul.f32.vlgmr.msra.gmra.mxu0 %v1802_v13 }
  0x54   : > { %1334 = vmatpush.msk.msrb.mxu0 %vm392_vm15, %v1729_v39  ;;  %1350 = vmatpush.msk.msrb.mxu1 %vm3824_vm1, %v1729_v39  ;;  %vm3831_vm1 = vcmp.eq.s32.totalorder %v2051_v1, %v1906_v49 }
  0x55   : > { %963 = vrot.lane.b32.xlu0 %v957_v17, %s1731_s30  ;;  %584 = vmatmul.f32.vlgmr.msra.gmra.mxu1 %v1804_v14  ;;  %v956_v17 = vld.sshfl [vmem:[#allocation1 + $0x8] sm:$0xff pattern:$0x75316420] }
  0x56   : > { %1335 = vmatpush.msk.msrb.mxu0 %vm3827_vm11, %v1729_v39  ;;  %1351 = vmatpush.msk.msrb.mxu1 %vm3828_vm13, %v1729_v39  ;;  %vm3842_vm11 = vcmp.eq.s32.totalorder %v1893_v44, %v1838_v34  ;;  %vm3834_vm13 = vcmp.eq.s32.totalorder %v2084_v5, %v1906_v49 }
  0x57   : > { %1364 = vmatpush.msk.msrb.mxu2 %vm3842_vm11, %v1729_v39  ;;  %vm3843_vm11 = vcmp.eq.s32.totalorder %v1844_v36, %v1838_v34  ;;  %965 = vrot.lane.b32.xlu1 %v958_v24, %s1731_s30  ;;  %v1699_v24 = vpack.i.bf16 %v956_v17, %v955_v25 }
  0x58   : > { %1336 = vmatpush.msk.msrb.mxu0 %vm3830_vm14, %v1729_v39  ;;  %1352 = vmatpush.msk.msrb.mxu1 %vm3829_vm4, %v1729_v39  ;;  %vm3835_vm4 = vcmp.eq.s32.totalorder %v2120_v20, %v1906_v49  ;;  %vm3836_vm14 = vcmp.eq.s32.totalorder %v2211_v2, %v1906_v49 }
  0x59   : > { %1377 = vmatpush.msk.msrb.mxu3 %vm3843_vm11, %v1729_v39  ;;  %vm3844_vm11 = vcmp.eq.s32.totalorder %v1917_v50, %v1838_v34  ;;  %604 = vmatmul.f32.vlgmr.msra.gmra.mxu2 %v1806_v15 }
  0x5a   : > { %1337 = vmatpush.msk.msrb.mxu0 %vm3831_vm1, %v1729_v39  ;;  %1353 = vmatpush.msk.msrb.mxu1 %vm3832_vm6, %v1729_v39  ;;  %vm3845_vm1 = vcmp.eq.s32.totalorder %v1856_v38, %v1838_v34  ;;  %vm3837_vm6 = vcmp.eq.s32.totalorder %v2139_v21, %v1906_v49 }
  0x5b   : > { %1365 = vmatpush.msk.msrb.mxu2 %vm3844_vm11, %v1729_v39  ;;  %1378 = vmatpush.msk.msrb.mxu3 %vm3845_vm1, %v1729_v39  ;;  %vm3838_vm11 = vcmp.eq.s32.totalorder %v2253_v47, %v1906_v49  ;;  %vm378_vm1 = vcmp.eq.s32.totalorder %v2188_v28, %v1906_v49 }
  0x5c   : > { %1338 = vmatpush.msk.msrb.mxu0 %vm3834_vm13, %v1729_v39  ;;  %1354 = vmatpush.msk.msrb.mxu1 %vm3833_vm9, %v1729_v39  ;;  %vm3840_vm9 = vcmp.eq.s32.totalorder %v2280_v48, %v1906_v49  ;;  %vm3846_vm13 = vcmp.eq.s32.totalorder %v1947_v53, %v1838_v34 }
  0x5d   : > { %1366 = vmatpush.msk.msrb.mxu2 %vm3846_vm13, %v1729_v39  ;;  %vm3839_vm13 = vcmp.eq.s32.totalorder %v2307_v56, %v1906_v49  ;;  %1700 = vrot.lane.b32.xlu2 %v1699_v24, %s1731_s30 }
  0x5e   : > { %1339 = vmatpush.msk.msrb.mxu0 %vm3835_vm4, %v1729_v39  ;;  %1355 = vmatpush.msk.msrb.mxu1 %vm3836_vm14, %v1729_v39  ;;  %vm3847_vm4 = vcmp.eq.s32.totalorder %v1879_v42, %v1838_v34  ;;  %vm376_vm14 = vcmp.eq.s32.totalorder %v2218_v29, %v1906_v49 }
  0x5f   : > { %1379 = vmatpush.msk.msrb.mxu3 %vm3847_vm4, %v1729_v39  ;;  %vm3848_vm4 = vcmp.eq.s32.totalorder %v1985_v58, %v1838_v34 }
  0x60   : > { %1340 = vmatpush.msk.msrb.mxu0 %vm3837_vm6, %v1729_v39  ;;  %1356 = vmatpush.msk.msrb.mxu1 %vm3838_vm11, %v1729_v39  ;;  %vm3849_vm6 = vcmp.eq.s32.totalorder %v1896_v45, %v1838_v34  ;;  %vm3850_vm11 = vcmp.eq.s32.totalorder %v2015_v61, %v1838_v34 }
  0x61   : > { %1367 = vmatpush.msk.msrb.mxu2 %vm3848_vm4, %v1729_v39  ;;  %1380 = vmatpush.msk.msrb.mxu3 %vm3849_vm6, %v1729_v39  ;;  %vm3851_vm4 = vcmp.eq.s32.totalorder %v1930_v52, %v1838_v34  ;;  %vm3852_vm6 = vcmp.eq.s32.totalorder %v1872_v41, %v1838_v34 }
  0x62   : > { %1341 = vmatpush.msk.msrb.mxu0 %vm378_vm1, %v1729_v39  ;;  %1357 = vmatpush.msk.msrb.mxu1 %vm3840_vm9, %v1729_v39  ;;  %vm3862_vm9 = vcmp.eq.s32.totalorder %v2103_v6, %v1838_v34 }
  0x63   : > { %1368 = vmatpush.msk.msrb.mxu2 %vm3850_vm11, %v1729_v39  ;;  %1381 = vmatpush.msk.msrb.mxu3 %vm3851_vm4, %v1729_v39  ;;  %vm3853_vm11 = vcmp.eq.s32.totalorder %v1826_v30, %v1906_v49  ;;  %vm3854_vm4 = vcmp.eq.s32.totalorder %v2048_v0, %v1838_v34 }
  0x64   : > { %1342 = vmatpush.msk.msrb.mxu0 %vm376_vm14, %v1729_v39  ;;  %1358 = vmatpush.msk.msrb.mxu1 %vm3839_vm13, %v1729_v39  ;;  %vm3855_vm13 = vcmp.eq.s32.totalorder %v1959_v55, %v1838_v34 }
  0x65   : > { %1369 = vmatpush.msk.msrb.mxu2 %vm3854_vm4, %v1729_v39  ;;  %1382 = vmatpush.msk.msrb.mxu3 %vm3855_vm13, %v1729_v39  ;;  %vm3858_vm4 = vcmp.eq.s32.totalorder %v2081_v4, %v1838_v34  ;;  %vm3859_vm13 = vcmp.eq.s32.totalorder %v1899_v46, %v1838_v34 }
  0x66   : > { %1391 = vmatpush.msk.msra.mxu0 %vm3852_vm6, %v1729_v39  ;;  %1407 = vmatpush.msk.msra.mxu1 %vm3853_vm11, %v1729_v39  ;;  %vm3856_vm6 = vcmp.eq.s32.totalorder %v1882_v43, %v1838_v34  ;;  %vm3857_vm11 = vcmp.eq.s32.totalorder %v1830_v31, %v1906_v49 }
  0x67   : > { %1370 = vmatpush.msk.msrb.mxu2 %vm3858_vm4, %v1729_v39  ;;  %vm3863_vm4 = vcmp.eq.s32.totalorder %v1923_v51, %v1838_v34  ;;  %624 = vmatmul.f32.vlgmr.msra.gmra.mxu3 %v1802_v13 }
  0x68   : > { %1392 = vmatpush.msk.msra.mxu0 %vm3856_vm6, %v1729_v39  ;;  %1408 = vmatpush.msk.msra.mxu1 %vm3857_vm11, %v1729_v39  ;;  %vm3860_vm6 = vcmp.eq.s32.totalorder %v1841_v35, %v1906_v49  ;;  %vm3861_vm11 = vcmp.eq.s32.totalorder %v1988_v59, %v1838_v34 }
  0x69   : > { %1383 = vmatpush.msk.msrb.mxu3 %vm3861_vm11, %v1729_v39  ;;  %1371 = vmatpush.msk.msrb.mxu2 %vm3862_vm9, %v1729_v39  ;;  %vm3866_vm11 = vcmp.eq.s32.totalorder %v2117_v18, %v1838_v34  ;;  %vm3867_vm9 = vcmp.eq.s32.totalorder %v1952_v54, %v1838_v34 }
  0x6a   : > { %1393 = vmatpush.msk.msra.mxu0 %vm3859_vm13, %v1729_v39  ;;  %1409 = vmatpush.msk.msra.mxu1 %vm3860_vm6, %v1729_v39  ;;  %vm3864_vm13 = vcmp.eq.s32.totalorder %v1847_v37, %v1906_v49  ;;  %vm3865_vm6 = vcmp.eq.s32.totalorder %v2018_v62, %v1838_v34 }
  0x6b   : > { %1384 = vmatpush.msk.msrb.mxu3 %vm3865_vm6, %v1729_v39  ;;  %1372 = vmatpush.msk.msrb.mxu2 %vm3866_vm11, %v1729_v39  ;;  %vm3870_vm6 = vcmp.eq.s32.totalorder %v2185_v27, %v1838_v34  ;;  %vm3871_vm11 = vcmp.eq.s32.totalorder %v1978_v57, %v1838_v34 }
  0x6c   : > { %1394 = vmatpush.msk.msra.mxu0 %vm3863_vm4, %v1729_v39  ;;  %1410 = vmatpush.msk.msra.mxu1 %vm3864_vm13, %v1729_v39  ;;  %vm3868_vm4 = vcmp.eq.s32.totalorder %v1869_v40, %v1906_v49  ;;  %vm3869_vm13 = vcmp.eq.s32.totalorder %v2051_v1, %v1838_v34 }
  0x6d   : > { %1385 = vmatpush.msk.msrb.mxu3 %vm3869_vm13, %v1729_v39  ;;  %1373 = vmatpush.msk.msrb.mxu2 %vm3870_vm6, %v1729_v39  ;;  %vm3874_vm13 = vcmp.eq.s32.totalorder %v1820_v22, %v1838_v34  ;;  %vm3875_vm6 = vcmp.eq.s32.totalorder %v2008_v60, %v1838_v34 }
  0x6e   : > { %1395 = vmatpush.msk.msra.mxu0 %vm3867_vm9, %v1729_v39  ;;  %1411 = vmatpush.msk.msra.mxu1 %vm3868_vm4, %v1729_v39  ;;  %vm3872_vm9 = vcmp.eq.s32.totalorder %v1893_v44, %v1906_v49  ;;  %vm3873_vm4 = vcmp.eq.s32.totalorder %v2084_v5, %v1838_v34 }
  0x6f   : > { %1386 = vmatpush.msk.msrb.mxu3 %vm3873_vm4, %v1729_v39  ;;  %1374 = vmatpush.msk.msrb.mxu2 %vm3874_vm13, %v1729_v39  ;;  %vm3878_vm4 = vcmp.eq.s32.totalorder %v2041_v63, %v1838_v34  ;;  %vm3879_vm13 = vcmp.eq.s32.totalorder %v1947_v53, %v1906_v49 }
  0x70   : > { %1396 = vmatpush.msk.msra.mxu0 %vm3871_vm11, %v1729_v39  ;;  %1412 = vmatpush.msk.msra.mxu1 %vm3872_vm9, %v1729_v39  ;;  %vm3876_vm11 = vcmp.eq.s32.totalorder %v1917_v50, %v1906_v49  ;;  %vm3877_vm9 = vcmp.eq.s32.totalorder %v2120_v20, %v1838_v34 }
  0x71   : > { %1387 = vmatpush.msk.msrb.mxu3 %vm3877_vm9, %v1729_v39  ;;  %vm3882_vm9 = vcmp.eq.s32.totalorder %v2074_v3, %v1838_v34  ;;  %644 = vmatmul.f32.vlgmr.msrb.gmra.mxu0 %v1804_v14 }
  0x72   : > { %1397 = vmatpush.msk.msra.mxu0 %vm3875_vm6, %v1729_v39  ;;  %1413 = vmatpush.msk.msra.mxu1 %vm3876_vm11, %v1729_v39  ;;  %vm3880_vm6 = vcmp.eq.s32.totalorder %v1833_v32, %v1906_v49  ;;  %vm3881_vm11 = vcmp.eq.s32.totalorder %v2139_v21, %v1838_v34 }
  0x73   : > { %1423 = vmatpush.msk.msra.mxu2 %vm3880_vm6, %v1729_v39  ;;  %1388 = vmatpush.msk.msrb.mxu3 %vm3881_vm11, %v1729_v39  ;;  %vm3885_vm6 = vcmp.eq.s32.totalorder %v2188_v28, %v1838_v34  ;;  %vm3886_vm11 = vcmp.eq.s32.totalorder %v2110_v7, %v1838_v34 }
  0x74   : > { %1398 = vmatpush.msk.msra.mxu0 %vm3878_vm4, %v1729_v39  ;;  %1414 = vmatpush.msk.msra.mxu1 %vm3879_vm13, %v1729_v39  ;;  %vm3883_vm4 = vcmp.eq.s32.totalorder %v1985_v58, %v1906_v49  ;;  %vm3884_vm13 = vcmp.eq.s32.totalorder %v1836_v33, %v1906_v49 }
  0x75   : > { %1424 = vmatpush.msk.msra.mxu2 %vm3884_vm13, %v1729_v39  ;;  %1389 = vmatpush.msk.msrb.mxu3 %vm3885_vm6, %v1729_v39  ;;  %vm3889_vm13 = vcmp.eq.s32.totalorder %v2048_v0, %v1906_v49  ;;  %vm3890_vm6 = vcmp.eq.s32.totalorder %v2218_v29, %v1838_v34 }
  0x76   : > { %1399 = vmatpush.msk.msra.mxu0 %vm3882_vm9, %v1729_v39  ;;  %1415 = vmatpush.msk.msra.mxu1 %vm3883_vm4, %v1729_v39  ;;  %vm3887_vm9 = vcmp.eq.s32.totalorder %v2015_v61, %v1906_v49  ;;  %vm3888_vm4 = vcmp.eq.s32.totalorder %v2146_v23, %v1838_v34 }
  0x77   : > { %1425 = vmatpush.msk.msra.mxu2 %vm402_vm3, %v1729_v39  ;;  %1390 = vmatpush.msk.msrb.mxu3 %vm3890_vm6, %v1729_v39  ;;  %vm3895_vm6 = vcmp.eq.s32.totalorder %v2253_v47, %v1838_v34 }
  0x78   : > { %1400 = vmatpush.msk.msra.mxu0 %vm3886_vm11, %v1729_v39  ;;  %1416 = vmatpush.msk.msra.mxu1 %vm3887_vm9, %v1729_v39  ;;  %vm3891_vm11 = vcmp.eq.s32.totalorder %v2177_v26, %v1838_v34  ;;  %vm3892_vm9 = vcmp.eq.s32.totalorder %v2211_v2, %v1838_v34 }
  0x79   : > { %1426 = vmatpush.msk.msra.mxu2 %vm400_vm5, %v1729_v39  ;;  %664 = vmatmul.f32.vlgmr.msrb.gmra.mxu1 %v1806_v15 }
  0x7a   : > { %1401 = vmatpush.msk.msra.mxu0 %vm3888_vm4, %v1729_v39  ;;  %1417 = vmatpush.msk.msra.mxu1 %vm3889_vm13, %v1729_v39  ;;  %vm3893_vm4 = vcmp.eq.s32.totalorder %v1872_v41, %v1906_v49  ;;  %vm3894_vm13 = vcmp.eq.s32.totalorder %v2103_v6, %v1906_v49 }
  0x7b   : > { %1427 = vmatpush.msk.msra.mxu2 %vm398_vm7, %v1729_v39  ;;  %1439 = vmatpush.msk.msra.mxu3 %vm3893_vm4, %v1729_v39  ;;  %vm3898_vm4 = vcmp.eq.s32.totalorder %v2280_v48, %v1838_v34 }
  0x7c   : > { %1402 = vmatpush.msk.msra.mxu0 %vm3891_vm11, %v1729_v39  ;;  %1418 = vmatpush.msk.msra.mxu1 %vm352_vm12, %v1729_v39  ;;  %vm3896_vm11 = vcmp.eq.s32.totalorder %v1882_v43, %v1906_v49 }
  0x7d   : > { %1428 = vmatpush.msk.msra.mxu2 %vm396_vm10, %v1729_v39  ;;  %1440 = vmatpush.msk.msra.mxu3 %vm3896_vm11, %v1729_v39  ;;  %vm3901_vm11 = vcmp.eq.s32.totalorder %v2307_v56, %v1838_v34 }
  0x7e   : > { %1403 = vmatpush.msk.msra.mxu0 %vm3892_vm9, %v1729_v39  ;;  %1419 = vmatpush.msk.msra.mxu1 %vm3894_vm13, %v1729_v39  ;;  %vm3897_vm9 = vcmp.eq.s32.totalorder %v2117_v18, %v1906_v49  ;;  %vm3899_vm13 = vcmp.eq.s32.totalorder %v1899_v46, %v1906_v49 }
  0x7f   : > { %1441 = vmatpush.msk.msra.mxu3 %vm3899_vm13, %v1729_v39  ;;  %1429 = vmatpush.msk.msra.mxu2 %vm394_vm0, %v1729_v39  ;;  %vm3904_vm13 = vcmp.eq.s32.totalorder %v1952_v54, %v1906_v49 }
  0x80   : > { %1404 = vmatpush.msk.msra.mxu0 %vm3895_vm6, %v1729_v39  ;;  %1420 = vmatpush.msk.msra.mxu1 %vm3897_vm9, %v1729_v39  ;;  %vm3900_vm6 = vcmp.eq.s32.totalorder %v2185_v27, %v1906_v49  ;;  %vm3902_vm9 = vcmp.eq.s32.totalorder %v1923_v51, %v1906_v49 }
  0x81   : > { %1442 = vmatpush.msk.msra.mxu3 %vm3902_vm9, %v1729_v39  ;;  %1430 = vmatpush.msk.msra.mxu2 %vm392_vm15, %v1729_v39  ;;  %vm3907_vm9 = vcmp.eq.s32.totalorder %v1978_v57, %v1906_v49 }
  0x82   : > { %1405 = vmatpush.msk.msra.mxu0 %vm3898_vm4, %v1729_v39  ;;  %1421 = vmatpush.msk.msra.mxu1 %vm3900_vm6, %v1729_v39  ;;  %vm3903_vm4 = vcmp.eq.s32.totalorder %v1826_v30, %v1838_v34  ;;  %vm3905_vm6 = vcmp.eq.s32.totalorder %v1830_v31, %v1838_v34 }
  0x83   : > { %1443 = vmatpush.msk.msra.mxu3 %vm3904_vm13, %v1729_v39  ;;  %vm3909_vm13 = vcmp.eq.s32.totalorder %v1836_v33, %v1838_v34 }
  0x84   : > { %1406 = vmatpush.msk.msra.mxu0 %vm3901_vm11, %v1729_v39  ;;  %1422 = vmatpush.msk.msra.mxu1 %vm344_vm8, %v1729_v39  ;;  %vm3906_vm11 = vcmp.eq.s32.totalorder %v1988_v59, %v1906_v49 }
  0x85   : > { %1431 = vmatpush.msk.msra.mxu2 %vm3906_vm11, %v1729_v39  ;;  %1444 = vmatpush.msk.msra.mxu3 %vm3907_vm9, %v1729_v39  ;;  %vm3911_vm11 = vcmp.eq.s32.totalorder %v2008_v60, %v1906_v49  ;;  %vm3912_vm9 = vcmp.eq.s32.totalorder %v1847_v37, %v1838_v34 }
  0x86   : > { %1455 = vmatpush.msk.msrb.mxu0 %vm3903_vm4, %v1729_v39  ;;  %1471 = vmatpush.msk.msrb.mxu1 %vm405_vm2, %v1729_v39  ;;  %vm3908_vm4 = vcmp.eq.s32.totalorder %v1841_v35, %v1838_v34 }
  0x87   : > { %1445 = vmatpush.msk.msra.mxu3 %vm3911_vm11, %v1729_v39  ;;  %vm3916_vm11 = vcmp.eq.s32.totalorder %v1869_v40, %v1838_v34 }
  0x88   : > { %1456 = vmatpush.msk.msrb.mxu0 %vm3905_vm6, %v1729_v39  ;;  %1472 = vmatpush.msk.msrb.mxu1 %vm3909_vm13, %v1729_v39  ;;  %vm3910_vm6 = vcmp.eq.s32.totalorder %v2018_v62, %v1906_v49  ;;  %vm3914_vm13 = vcmp.eq.s32.totalorder %v2051_v1, %v1906_v49 }
  0x89   : > { %1432 = vmatpush.msk.msra.mxu2 %vm3910_vm6, %v1729_v39  ;;  %vm3915_vm6 = vcmp.eq.s32.totalorder %v2041_v63, %v1906_v49 }
  0x8a   : > { %1457 = vmatpush.msk.msrb.mxu0 %vm3908_vm4, %v1729_v39  ;;  %vm3913_vm4 = vcmp.eq.s32.totalorder %v1844_v36, %v1838_v34  ;;  %1446 = vmatpush.msk.msra.mxu3 %vm3915_vm6, %v1729_v39  ;;  %vm3920_vm6 = vcmp.eq.s32.totalorder %v1893_v44, %v1838_v34 }
  0x8b   : > { %1473 = vmatpush.msk.msrb.mxu1 %vm3913_vm4, %v1729_v39  ;;  %1433 = vmatpush.msk.msra.mxu2 %vm3914_vm13, %v1729_v39  ;;  %vm3918_vm4 = vcmp.eq.s32.totalorder %v2084_v5, %v1906_v49  ;;  %vm3919_vm13 = vcmp.eq.s32.totalorder %v2074_v3, %v1906_v49 }
  0x8c   : > { %1458 = vmatpush.msk.msrb.mxu0 %vm3912_vm9, %v1729_v39  ;;  %vm3917_vm9 = vcmp.eq.s32.totalorder %v1856_v38, %v1838_v34  ;;  %1447 = vmatpush.msk.msra.mxu3 %vm3919_vm13, %v1729_v39  ;;  %vm3924_vm13 = vcmp.eq.s32.totalorder %v1917_v50, %v1838_v34 }
  0x8d   : > { %1474 = vmatpush.msk.msrb.mxu1 %vm3917_vm9, %v1729_v39  ;;  %1434 = vmatpush.msk.msra.mxu2 %vm3918_vm4, %v1729_v39  ;;  %vm3922_vm9 = vcmp.eq.s32.totalorder %v2120_v20, %v1906_v49  ;;  %vm3923_vm4 = vcmp.eq.s32.totalorder %v2110_v7, %v1906_v49 }
  0x8e   : > { %1459 = vmatpush.msk.msrb.mxu0 %vm3916_vm11, %v1729_v39  ;;  %vm3921_vm11 = vcmp.eq.s32.totalorder %v1879_v42, %v1838_v34  ;;  %1448 = vmatpush.msk.msra.mxu3 %vm3923_vm4, %v1729_v39  ;;  %vm3928_vm4 = vcmp.eq.s32.totalorder %v1947_v53, %v1838_v34 }
  0x8f   : > { %1475 = vmatpush.msk.msrb.mxu1 %vm3921_vm11, %v1729_v39  ;;  %1435 = vmatpush.msk.msra.mxu2 %vm3922_vm9, %v1729_v39  ;;  %vm3926_vm11 = vcmp.eq.s32.totalorder %v2139_v21, %v1906_v49  ;;  %vm3927_vm9 = vcmp.eq.s32.totalorder %v2146_v23, %v1906_v49 }
  0x90   : > { %1460 = vmatpush.msk.msrb.mxu0 %vm3920_vm6, %v1729_v39  ;;  %vm3925_vm6 = vcmp.eq.s32.totalorder %v1896_v45, %v1838_v34  ;;  %1449 = vmatpush.msk.msra.mxu3 %vm3927_vm9, %v1729_v39  ;;  %vm683_vm9 = vcmask 900096  }
  0x91   : > { %1476 = vmatpush.msk.msrb.mxu1 %vm3925_vm6, %v1729_v39  ;;  %1436 = vmatpush.msk.msra.mxu2 %vm3926_vm11, %v1729_v39  ;;  %vm3930_vm6 = vcmp.eq.s32.totalorder %v2177_v26, %v1906_v49  ;;  %vm3931_vm11 = vcmp.eq.s32.totalorder %v1985_v58, %v1838_v34 }
  0x92   : > { %1461 = vmatpush.msk.msrb.mxu0 %vm3924_vm13, %v1729_v39  ;;  %vm3929_vm13 = vcmp.eq.s32.totalorder %v1930_v52, %v1838_v34  ;;  %1450 = vmatpush.msk.msra.mxu3 %vm3930_vm6, %v1729_v39  ;;  %vm3934_vm6 = vcmp.eq.s32.totalorder %v2015_v61, %v1838_v34 }
  0x93   : > { %1477 = vmatpush.msk.msrb.mxu1 %vm3929_vm13, %v1729_v39  ;;  %1437 = vmatpush.msk.msra.mxu2 %vm378_vm1, %v1729_v39  ;;  %vm3933_vm13 = vcmp.eq.s32.totalorder %v2211_v2, %v1906_v49 }
  0x94   : > { %1462 = vmatpush.msk.msrb.mxu0 %vm3928_vm4, %v1729_v39  ;;  %vm3932_vm4 = vcmp.eq.s32.totalorder %v1959_v55, %v1838_v34  ;;  %1451 = vmatpush.msk.msra.mxu3 %vm3933_vm13, %v1729_v39  ;;  %vm3937_vm13 = vcmp.eq.s32.totalorder %v2253_v47, %v1906_v49  ;;  %v682_v17 = vpop.permute.xlu1 %681 }
  0x95   : > { %v1686_v13 = vpop.permute.xlu0 %1685  ;;  %1478 = vmatpush.msk.msrb.mxu1 %vm3932_vm4, %v1729_v39  ;;  %1438 = vmatpush.msk.msra.mxu2 %vm376_vm14, %v1729_v39  ;;  %vm3936_vm4 = vcmp.eq.s32.totalorder %v1872_v41, %v1838_v34 }
  0x96   : > { %1463 = vmatpush.msk.msrb.mxu0 %vm3931_vm11, %v1729_v39  ;;  %v1688_v14 = vunpack.i.h.bf16 %v1686_v13  ;;  %v1687_v15 = vunpack.i.l.bf16 %v1686_v13  ;;  %vm3935_vm11 = vcmp.eq.s32.totalorder %v1988_v59, %v1838_v34  ;;  %1452 = vmatpush.msk.msra.mxu3 %vm3937_vm13, %v1729_v39  ;;  %vm3941_vm13 = vcmp.eq.s32.totalorder %v2280_v48, %v1906_v49 }
  0x97   : > { %1479 = vmatpush.msk.msrb.mxu1 %vm3935_vm11, %v1729_v39  ;;  %vm3939_vm11 = vcmp.eq.s32.totalorder %v2018_v62, %v1838_v34 }
  0x98   : > { %1464 = vmatpush.msk.msrb.mxu0 %vm3934_vm6, %v1729_v39  ;;  %v684_v25 = vsel %vm683_vm9, %v1687_v15, %v1688_v14  ;;  %vm3938_vm6 = vcmp.eq.s32.totalorder %v2048_v0, %v1838_v34  ;;  %1453 = vmatpush.msk.msra.mxu3 %vm3941_vm13, %v1729_v39  ;;  %vm3945_vm13 = vcmp.eq.s32.totalorder %v2307_v56, %v1906_v49 }
  0x99   : > { %706 = vmatmul.f32.vlgmr.msrb.gmra.mxu2 %v684_v25  ;;  %766 = vmatmul.f32.vlgmr.msra.gmra.mxu1 %v684_v25 }
  0x9a   : > { %1487 = vmatpush.msk.msrb.mxu2 %vm3936_vm4, %v1729_v39  ;;  %1465 = vmatpush.msk.msrb.mxu0 %vm3938_vm6, %v1729_v39  ;;  %vm3940_vm4 = vcmp.eq.s32.totalorder %v1882_v43, %v1838_v34  ;;  %vm3942_vm6 = vcmp.eq.s32.totalorder %v2081_v4, %v1838_v34 }
  0x9b   : > { %1480 = vmatpush.msk.msrb.mxu1 %vm3939_vm11, %v1729_v39  ;;  %vm3943_vm11 = vcmp.eq.s32.totalorder %v2051_v1, %v1838_v34  ;;  %1454 = vmatpush.msk.msra.mxu3 %vm3945_vm13, %v1729_v39  ;;  %vm3950_vm13 = vcmp.eq.s32.totalorder %v2117_v18, %v1838_v34 }
  0x9c   : > { %1488 = vmatpush.msk.msrb.mxu2 %vm3940_vm4, %v1729_v39  ;;  %1466 = vmatpush.msk.msrb.mxu0 %vm3942_vm6, %v1729_v39  ;;  %vm3944_vm4 = vcmp.eq.s32.totalorder %v1899_v46, %v1838_v34  ;;  %vm3946_vm6 = vcmp.eq.s32.totalorder %v2103_v6, %v1838_v34 }
  0x9d   : > { %1481 = vmatpush.msk.msrb.mxu1 %vm3943_vm11, %v1729_v39  ;;  %v680_v24 = vpop.permute.xlu0 %679  ;;  %vm3947_vm11 = vcmp.eq.s32.totalorder %v2084_v5, %v1838_v34 }
  0x9e   : > { %v686_v13 = vsel %vm683_vm9, %v680_v24, %v682_v17  ;;  %1489 = vmatpush.msk.msrb.mxu2 %vm3944_vm4, %v1729_v39  ;;  %v685_v15 = vsel %vm683_vm9, %v1688_v14, %v680_v24  ;;  %1467 = vmatpush.msk.msrb.mxu0 %vm3946_vm6, %v1729_v39  ;;  %vm3948_vm4 = vcmp.eq.s32.totalorder %v1923_v51, %v1838_v34 }
  0x9f   : > { %1482 = vmatpush.msk.msrb.mxu1 %vm3947_vm11, %v1729_v39  ;;  %726 = vmatmul.f32.vlgmr.msrb.gmra.mxu3 %v685_v15  ;;  %vm3949_vm9 = vcmp.eq.s32.totalorder %v1826_v30, %v1906_v49  ;;  %vm3951_vm6 = vcmp.eq.s32.totalorder %v2120_v20, %v1838_v34  ;;  %vm3952_vm11 = vcmp.eq.s32.totalorder %v1830_v31, %v1906_v49  ;;  %v1691_v14 = vpop.permute.xlu1 %1690 }
  0xa0   : > { %746 = vmatmul.f32.vlgmr.msra.gmra.mxu0 %v686_v13  ;;  %1490 = vmatpush.msk.msrb.mxu2 %vm3948_vm4, %v1729_v39  ;;  %vm3953_vm4 = vcmp.eq.s32.totalorder %v1952_v54, %v1838_v34  ;;  %v1693_v25 = vunpack.i.h.bf16 %v1691_v14  ;;  %v1692_v17 = vunpack.i.l.bf16 %v1691_v14 }
  0xa1   : > { %1503 = vmatpush.msk.msrb.mxu3 %vm3949_vm9, %v1729_v39  ;;  %1468 = vmatpush.msk.msrb.mxu0 %vm3950_vm13, %v1729_v39  ;;  %vm3954_vm9 = vcmp.eq.s32.totalorder %v2185_v27, %v1838_v34  ;;  %vm3955_vm13 = vcmp.eq.s32.totalorder %v2139_v21, %v1838_v34 }
  0xa2   : > { %1483 = vmatpush.msk.msrb.mxu1 %vm3951_vm6, %v1729_v39  ;;  %786 = vmatmul.f32.vlgmr.msra.gmra.mxu2 %v685_v15  ;;  %vm3956_vm6 = vcmp.eq.s32.totalorder %v1841_v35, %v1906_v49 }
  0xa3   : > { %1504 = vmatpush.msk.msrb.mxu3 %vm3952_vm11, %v1729_v39  ;;  %1491 = vmatpush.msk.msrb.mxu2 %vm3953_vm4, %v1729_v39  ;;  %vm3957_vm11 = vcmp.eq.s32.totalorder %v1978_v57, %v1838_v34  ;;  %vm3958_vm4 = vcmp.eq.s32.totalorder %v1820_v22, %v1838_v34 }
  0xa4   : > { %1469 = vmatpush.msk.msrb.mxu0 %vm3954_vm9, %v1729_v39  ;;  %1484 = vmatpush.msk.msrb.mxu1 %vm3955_vm13, %v1729_v39  ;;  %vm3959_vm9 = vcmp.eq.s32.totalorder %v2188_v28, %v1838_v34  ;;  %vm3960_vm13 = vcmp.eq.s32.totalorder %v1847_v37, %v1906_v49 }
  0xa5   : > { %1505 = vmatpush.msk.msrb.mxu3 %vm3956_vm6, %v1729_v39  ;;  %1492 = vmatpush.msk.msrb.mxu2 %vm3957_vm11, %v1729_v39  ;;  %vm3961_vm6 = vcmp.eq.s32.totalorder %v2008_v60, %v1838_v34  ;;  %vm3962_vm11 = vcmp.eq.s32.totalorder %v1833_v32, %v1906_v49  ;;  %v1696_v24 = vpop.permute.xlu2 %1695 }
  0xa6   : > { %1470 = vmatpush.msk.msrb.mxu0 %vm3958_vm4, %v1729_v39  ;;  %1485 = vmatpush.msk.msrb.mxu1 %vm3959_vm9, %v1729_v39  ;;  %vm3963_vm4 = vcmp.eq.s32.totalorder %v2218_v29, %v1838_v34  ;;  %vm3964_vm9 = vcmp.eq.s32.totalorder %v2041_v63, %v1838_v34  ;;  %v1697_v15 = vunpack.i.l.bf16 %v1696_v24 }
  0xa7   : > { %1506 = vmatpush.msk.msrb.mxu3 %vm3960_vm13, %v1729_v39  ;;  %1493 = vmatpush.msk.msrb.mxu2 %vm3961_vm6, %v1729_v39  ;;  %vm3965_vm13 = vcmp.eq.s32.totalorder %v1869_v40, %v1906_v49  ;;  %vm3966_vm6 = vcmp.eq.s32.totalorder %v1836_v33, %v1906_v49 }
  0xa8   : > { %1519 = vmatpush.msk.msra.mxu0 %vm3962_vm11, %v1729_v39  ;;  %1486 = vmatpush.msk.msrb.mxu1 %vm3963_vm4, %v1729_v39  ;;  %vm3967_vm11 = vcmp.eq.s32.totalorder %v1872_v41, %v1906_v49  ;;  %vm3968_vm4 = vcmp.eq.s32.totalorder %v2074_v3, %v1838_v34 }
  0xa9   : > { %806 = vmatmul.f32.vlgmr.msra.gmra.mxu3 %v686_v13  ;;  %1494 = vmatpush.msk.msrb.mxu2 %vm3964_vm9, %v1729_v39  ;;  %vm3969_vm9 = vcmp.eq.s32.totalorder %v1893_v44, %v1906_v49  ;;  %v1698_v13 = vunpack.i.h.bf16 %v1696_v24 }
  0xaa   : > { %1507 = vmatpush.msk.msrb.mxu3 %vm3965_vm13, %v1729_v39  ;;  %1520 = vmatpush.msk.msra.mxu0 %vm3966_vm6, %v1729_v39  ;;  %vm3970_vm13 = vcmp.eq.s32.totalorder %v1882_v43, %v1906_v49  ;;  %vm3971_vm6 = vcmp.eq.s32.totalorder %v2110_v7, %v1838_v34 }
  0xab   : > { %1535 = vmatpush.msk.msra.mxu1 %vm3967_vm11, %v1729_v39  ;;  %1495 = vmatpush.msk.msrb.mxu2 %vm3968_vm4, %v1729_v39  ;;  %vm3972_vm11 = vcmp.eq.s32.totalorder %v1917_v50, %v1906_v49  ;;  %vm3973_vm4 = vcmp.eq.s32.totalorder %v1899_v46, %v1906_v49 }
  0xac   : > { %1508 = vmatpush.msk.msrb.mxu3 %vm3969_vm9, %v1729_v39  ;;  %1521 = vmatpush.msk.msra.mxu0 %vm402_vm3, %v1729_v39  ;;  %vm3974_vm9 = vcmp.eq.s32.totalorder %v2146_v23, %v1838_v34 }
  0xad   : > { %1536 = vmatpush.msk.msra.mxu1 %vm3970_vm13, %v1729_v39  ;;  %1496 = vmatpush.msk.msrb.mxu2 %vm3971_vm6, %v1729_v39  ;;  %vm3975_vm13 = vcmp.eq.s32.totalorder %v1947_v53, %v1906_v49  ;;  %vm3976_vm6 = vcmp.eq.s32.totalorder %v1923_v51, %v1906_v49 }
  0xae   : > { %1509 = vmatpush.msk.msrb.mxu3 %vm3972_vm11, %v1729_v39  ;;  %1522 = vmatpush.msk.msra.mxu0 %vm400_vm5, %v1729_v39  ;;  %vm3977_vm11 = vcmp.eq.s32.totalorder %v2177_v26, %v1838_v34 }
  0xaf   : > { %1537 = vmatpush.msk.msra.mxu1 %vm3973_vm4, %v1729_v39  ;;  %1497 = vmatpush.msk.msrb.mxu2 %vm3974_vm9, %v1729_v39  ;;  %vm3978_vm4 = vcmp.eq.s32.totalorder %v1985_v58, %v1906_v49  ;;  %vm3979_vm9 = vcmp.eq.s32.totalorder %v1952_v54, %v1906_v49 }
  0xb0   : > { %1510 = vmatpush.msk.msrb.mxu3 %vm3975_vm13, %v1729_v39  ;;  %1523 = vmatpush.msk.msra.mxu0 %vm398_vm7, %v1729_v39  ;;  %vm3980_vm13 = vcmp.eq.s32.totalorder %v2211_v2, %v1838_v34 }
  0xb1   : > { %1538 = vmatpush.msk.msra.mxu1 %vm3976_vm6, %v1729_v39  ;;  %1498 = vmatpush.msk.msrb.mxu2 %vm3977_vm11, %v1729_v39  ;;  %vm3981_vm6 = vcmp.eq.s32.totalorder %v2015_v61, %v1906_v49  ;;  %vm3982_vm11 = vcmp.eq.s32.totalorder %v1978_v57, %v1906_v49 }
  0xb2   : > { %1511 = vmatpush.msk.msrb.mxu3 %vm3978_vm4, %v1729_v39  ;;  %1524 = vmatpush.msk.msra.mxu0 %vm396_vm10, %v1729_v39  ;;  %vm3983_vm4 = vcmp.eq.s32.totalorder %v2253_v47, %v1838_v34 }
  0xb3   : > { %1539 = vmatpush.msk.msra.mxu1 %vm3979_vm9, %v1729_v39  ;;  %1499 = vmatpush.msk.msrb.mxu2 %vm3980_vm13, %v1729_v39  ;;  %vm3984_vm9 = vcmp.eq.s32.totalorder %v2048_v0, %v1906_v49  ;;  %vm825_vm13 = vcmask 1039360  }
  0xb4   : > { %1512 = vmatpush.msk.msrb.mxu3 %vm3981_vm6, %v1729_v39  ;;  %1525 = vmatpush.msk.msra.mxu0 %vm394_vm0, %v1729_v39  ;;  %vm3985_vm6 = vcmp.eq.s32.totalorder %v2008_v60, %v1906_v49  ;;  %v828_v14 = vsel %vm825_vm13, %v1692_v17, %v1693_v25  ;;  %v826_v25 = vsel %vm825_vm13, %v1697_v15, %v1698_v13 }
  0xb5   : > { %1540 = vmatpush.msk.msra.mxu1 %vm3982_vm11, %v1729_v39  ;;  %1500 = vmatpush.msk.msrb.mxu2 %vm3983_vm4, %v1729_v39  ;;  %vm3986_vm11 = vcmp.eq.s32.totalorder %v2280_v48, %v1838_v34  ;;  %vm3987_vm4 = vcmp.eq.s32.totalorder %v1988_v59, %v1906_v49  ;;  %v827_v24 = vsel %vm825_vm13, %v1698_v13, %v1692_v17 }
  0xb6   : > { %1513 = vmatpush.msk.msrb.mxu3 %vm3984_vm9, %v1729_v39  ;;  %1526 = vmatpush.msk.msra.mxu0 %vm392_vm15, %v1729_v39  ;;  %vm3988_vm9 = vcmp.eq.s32.totalorder %v2041_v63, %v1906_v49  ;;  %vm4001_vm13 = vcmp.eq.s32.totalorder %v1841_v35, %v1838_v34 }
  0xb7   : > { %1541 = vmatpush.msk.msra.mxu1 %vm3985_vm6, %v1729_v39  ;;  %1501 = vmatpush.msk.msrb.mxu2 %vm3986_vm11, %v1729_v39  ;;  %vm3989_vm6 = vcmp.eq.s32.totalorder %v2307_v56, %v1838_v34  ;;  %vm3990_vm11 = vcmp.eq.s32.totalorder %v2103_v6, %v1906_v49 }
  0xb8   : > { %1514 = vmatpush.msk.msrb.mxu3 %vm352_vm12, %v1729_v39  ;;  %1527 = vmatpush.msk.msra.mxu0 %vm3987_vm4, %v1729_v39  ;;  %vm3991_vm4 = vcmp.eq.s32.totalorder %v2018_v62, %v1906_v49 }
  0xb9   : > { %1542 = vmatpush.msk.msra.mxu1 %vm3988_vm9, %v1729_v39  ;;  %1502 = vmatpush.msk.msrb.mxu2 %vm3989_vm6, %v1729_v39  ;;  %vm3992_vm9 = vcmp.eq.s32.totalorder %v2074_v3, %v1906_v49  ;;  %vm3993_vm6 = vcmp.eq.s32.totalorder %v2117_v18, %v1906_v49 }
  0xba   : > { %1515 = vmatpush.msk.msrb.mxu3 %vm3990_vm11, %v1729_v39  ;;  %1528 = vmatpush.msk.msra.mxu0 %vm3991_vm4, %v1729_v39  ;;  %vm3994_vm11 = vcmp.eq.s32.totalorder %v1826_v30, %v1838_v34  ;;  %vm3995_vm4 = vcmp.eq.s32.totalorder %v2051_v1, %v1906_v49 }
  0xbb   : > { %1543 = vmatpush.msk.msra.mxu1 %vm3992_vm9, %v1729_v39  ;;  %888 = vmatmul.f32.vlgmr.msrb.gmra.mxu2 %v828_v14  ;;  %vm3996_vm9 = vcmp.eq.s32.totalorder %v2110_v7, %v1906_v49 }
  0xbc   : > { %1516 = vmatpush.msk.msrb.mxu3 %vm3993_vm6, %v1729_v39  ;;  %1551 = vmatpush.msk.msra.mxu2 %vm3994_vm11, %v1729_v39  ;;  %vm3997_vm6 = vcmp.eq.s32.totalorder %v2185_v27, %v1906_v49  ;;  %vm3998_vm11 = vcmp.eq.s32.totalorder %v1830_v31, %v1838_v34 }
  0xbd   : > { %1529 = vmatpush.msk.msra.mxu0 %vm3995_vm4, %v1729_v39  ;;  %1544 = vmatpush.msk.msra.mxu1 %vm3996_vm9, %v1729_v39  ;;  %vm3999_vm4 = vcmp.eq.s32.totalorder %v2084_v5, %v1906_v49  ;;  %vm4000_vm9 = vcmp.eq.s32.totalorder %v2146_v23, %v1906_v49 }
  0xbe   : > { %1517 = vmatpush.msk.msrb.mxu3 %vm3997_vm6, %v1729_v39  ;;  %1552 = vmatpush.msk.msra.mxu2 %vm3998_vm11, %v1729_v39  ;;  %vm4002_vm6 = vcmp.eq.s32.totalorder %v2120_v20, %v1906_v49  ;;  %vm4003_vm11 = vcmp.eq.s32.totalorder %v2177_v26, %v1906_v49 }
  0xbf   : > { %1530 = vmatpush.msk.msra.mxu0 %vm3999_vm4, %v1729_v39  ;;  %1545 = vmatpush.msk.msra.mxu1 %vm4000_vm9, %v1729_v39  ;;  %vm4004_vm4 = vcmp.eq.s32.totalorder %v1847_v37, %v1838_v34  ;;  %vm4005_vm9 = vcmp.eq.s32.totalorder %v2139_v21, %v1906_v49 }
  0xc0   : > { %848 = vmatmul.f32.vlgmr.msrb.gmra.mxu0 %v826_v25  ;;  %868 = vmatmul.f32.vlgmr.msrb.gmra.mxu1 %v827_v24 }
  0xc1   : > { %1553 = vmatpush.msk.msra.mxu2 %vm4001_vm13, %v1729_v39  ;;  %1518 = vmatpush.msk.msrb.mxu3 %vm344_vm8, %v1729_v39  ;;  %vm4006_vm13 = vcmp.eq.s32.totalorder %v2211_v2, %v1906_v49 }
  0xc2   : > { %1531 = vmatpush.msk.msra.mxu0 %vm4002_vm6, %v1729_v39  ;;  %1546 = vmatpush.msk.msra.mxu1 %vm4003_vm11, %v1729_v39  ;;  %vm4007_vm6 = vcmp.eq.s32.totalorder %v1869_v40, %v1838_v34  ;;  %vm4008_vm11 = vcmp.eq.s32.totalorder %v1836_v33, %v1838_v34 }
  0xc3   : > { %908 = vmatmul.f32.vlgmr.msrb.gmra.mxu3 %v826_v25  ;;  %1554 = vmatpush.msk.msra.mxu2 %vm4004_vm4, %v1729_v39  ;;  %vm4010_vm4 = vcmp.eq.s32.totalorder %v1893_v44, %v1838_v34 }
  0xc4   : > { %1567 = vmatpush.msk.msra.mxu3 %vm405_vm2, %v1729_v39  ;;  %1532 = vmatpush.msk.msra.mxu0 %vm4005_vm9, %v1729_v39  ;;  %vm4009_vm2 = vcmp.eq.s32.totalorder %v2253_v47, %v1906_v49  ;;  %vm4011_vm9 = vcmp.eq.s32.totalorder %v1844_v36, %v1838_v34 }
  0xc5   : > { %1547 = vmatpush.msk.msra.mxu1 %vm4006_vm13, %v1729_v39  ;;  %1555 = vmatpush.msk.msra.mxu2 %vm4007_vm6, %v1729_v39  ;;  %vm4012_vm13 = vcmp.eq.s32.totalorder %v2280_v48, %v1906_v49  ;;  %vm4013_vm6 = vcmp.eq.s32.totalorder %v1917_v50, %v1838_v34 }
  0xc6   : > { %1568 = vmatpush.msk.msra.mxu3 %vm4008_vm11, %v1729_v39  ;;  %1533 = vmatpush.msk.msra.mxu0 %vm378_vm1, %v1729_v39  ;;  %vm4014_vm11 = vcmp.eq.s32.totalorder %v1856_v38, %v1838_v34 }
  0xc7   : > { %1548 = vmatpush.msk.msra.mxu1 %vm4009_vm2, %v1729_v39  ;;  %1556 = vmatpush.msk.msra.mxu2 %vm4010_vm4, %v1729_v39  ;;  %vm4015_vm2 = vcmp.eq.s32.totalorder %v2307_v56, %v1906_v49  ;;  %vm4016_vm4 = vcmp.eq.s32.totalorder %v1947_v53, %v1838_v34 }
  0xc8   : > { %1569 = vmatpush.msk.msra.mxu3 %vm4011_vm9, %v1729_v39  ;;  %1534 = vmatpush.msk.msra.mxu0 %vm376_vm14, %v1729_v39  ;;  %vm4017_vm9 = vcmp.eq.s32.totalorder %v1879_v42, %v1838_v34 }
  0xc9   : > { %1549 = vmatpush.msk.msra.mxu1 %vm4012_vm13, %v1729_v39  ;;  %928 = vmatmul.f32.vlgmr.msra.gmra.mxu0 %v827_v24  ;;  %vm4018_vm13 = vcmp.eq.s32.totalorder %v1872_v41, %v1838_v34  ;;  %v966_v36 = vpop.permute.xlu1 %965 }
  0xca   : > { %1557 = vmatpush.msk.msra.mxu2 %vm4013_vm6, %v1729_v39  ;;  %1570 = vmatpush.msk.msra.mxu3 %vm4014_vm11, %v1729_v39  ;;  %vm4019_vm6 = vcmp.eq.s32.totalorder %v1985_v58, %v1838_v34  ;;  %vm4020_vm11 = vcmp.eq.s32.totalorder %v1826_v30, %v1906_v49  ;;  %v1701_v30 = vpop.permute.xlu2 %1700 }
  0xcb   : > { %1550 = vmatpush.msk.msra.mxu1 %vm4015_vm2, %v1729_v39  ;;  %1583 = vmatpush.msk.msrb.mxu0 %vm4018_vm13, %v1729_v39  ;;  %vm4021_vm2 = vcmp.eq.s32.totalorder %v1896_v45, %v1838_v34  ;;  %vm4024_vm13 = vcmp.eq.s32.totalorder %v1830_v31, %v1906_v49  ;;  %v1703_v31 = vunpack.i.h.bf16 %v1701_v30 }
  0xcc   : > { %948 = vmatmul.f32.vlgmr.msra.gmra.mxu1 %v828_v14  ;;  %1558 = vmatpush.msk.msra.mxu2 %vm4016_vm4, %v1729_v39  ;;  %vm4022_vm4 = vcmp.eq.s32.totalorder %v1882_v43, %v1838_v34 }
  0xcd   : > { %1571 = vmatpush.msk.msra.mxu3 %vm4017_vm9, %v1729_v39  ;;  %1599 = vmatpush.msk.msrb.mxu1 %vm4020_vm11, %v1729_v39  ;;  %vm4023_vm9 = vcmp.eq.s32.totalorder %v2015_v61, %v1838_v34  ;;  %vm4026_vm11 = vcmp.eq.s32.totalorder %v1899_v46, %v1838_v34 }
  0xce   : > { %1559 = vmatpush.msk.msra.mxu2 %vm4019_vm6, %v1729_v39  ;;  %1584 = vmatpush.msk.msrb.mxu0 %vm4022_vm4, %v1729_v39  ;;  %vm4025_vm6 = vcmp.eq.s32.totalorder %v1930_v52, %v1838_v34  ;;  %vm4028_vm4 = vcmp.eq.s32.totalorder %v1841_v35, %v1906_v49  ;;  %v1702_v35 = vunpack.i.l.bf16 %v1701_v30 }
  0xcf   : > { %1572 = vmatpush.msk.msra.mxu3 %vm4021_vm2, %v1729_v39  ;;  %1600 = vmatpush.msk.msrb.mxu1 %vm4024_vm13, %v1729_v39  ;;  %vm4027_vm2 = vcmp.eq.s32.totalorder %v2048_v0, %v1838_v34  ;;  %vm4030_vm13 = vcmp.eq.s32.totalorder %v1923_v51, %v1838_v34 }
  0xd0   : > { %1560 = vmatpush.msk.msra.mxu2 %vm4023_vm9, %v1729_v39  ;;  %1585 = vmatpush.msk.msrb.mxu0 %vm4026_vm11, %v1729_v39  ;;  %vm4029_vm9 = vcmp.eq.s32.totalorder %v1959_v55, %v1838_v34  ;;  %vm4032_vm11 = vcmp.eq.s32.totalorder %v1847_v37, %v1906_v49  ;;  %v964_v37 = vpop.permute.xlu0 %963 }
  0xd1   : > { %1573 = vmatpush.msk.msra.mxu3 %vm4025_vm6, %v1729_v39  ;;  %1601 = vmatpush.msk.msrb.mxu1 %vm4028_vm4, %v1729_v39  ;;  %vm4031_vm6 = vcmp.eq.s32.totalorder %v2081_v4, %v1838_v34  ;;  %vm4034_vm4 = vcmp.eq.s32.totalorder %v1952_v54, %v1838_v34 }
  0xd2   : > { %1561 = vmatpush.msk.msra.mxu2 %vm4027_vm2, %v1729_v39  ;;  %1586 = vmatpush.msk.msrb.mxu0 %vm4030_vm13, %v1729_v39  ;;  %vm4033_vm2 = vcmp.eq.s32.totalorder %v1988_v59, %v1838_v34  ;;  %vm4036_vm13 = vcmp.eq.s32.totalorder %v1869_v40, %v1906_v49  ;;  %v585_v40 = vpop.f32.mrf.mxu1 }
  0xd3   : > { %1574 = vmatpush.msk.msra.mxu3 %vm4029_vm9, %v1729_v39  ;;  %1602 = vmatpush.msk.msrb.mxu1 %vm4032_vm11, %v1729_v39  ;;  %vm4035_vm9 = vcmp.eq.s32.totalorder %v2103_v6, %v1838_v34  ;;  %vm4038_vm11 = vcmp.eq.s32.totalorder %v1978_v57, %v1838_v34 }
  0xd4   : > { %1562 = vmatpush.msk.msra.mxu2 %vm4031_vm6, %v1729_v39  ;;  %1587 = vmatpush.msk.msrb.mxu0 %vm4034_vm4, %v1729_v39  ;;  %vm4037_vm6 = vcmp.eq.s32.totalorder %v2018_v62, %v1838_v34  ;;  %vm4040_vm4 = vcmp.eq.s32.totalorder %v1893_v44, %v1906_v49 }
  0xd5   : > { %1575 = vmatpush.msk.msra.mxu3 %vm4033_vm2, %v1729_v39  ;;  %1603 = vmatpush.msk.msrb.mxu1 %vm4036_vm13, %v1729_v39  ;;  %vm4039_vm2 = vcmp.eq.s32.totalorder %v2117_v18, %v1838_v34  ;;  %vm4042_vm13 = vcmp.eq.s32.totalorder %v2008_v60, %v1838_v34 }
  0xd6   : > { %1563 = vmatpush.msk.msra.mxu2 %vm4035_vm9, %v1729_v39  ;;  %1588 = vmatpush.msk.msrb.mxu0 %vm4038_vm11, %v1729_v39  ;;  %vm4041_vm9 = vcmp.eq.s32.totalorder %v2051_v1, %v1838_v34  ;;  %vm4044_vm11 = vcmp.eq.s32.totalorder %v1917_v50, %v1906_v49 }
  0xd7   : > { %1576 = vmatpush.msk.msra.mxu3 %vm4037_vm6, %v1729_v39  ;;  %1604 = vmatpush.msk.msrb.mxu1 %vm4040_vm4, %v1729_v39  ;;  %vm4043_vm6 = vcmp.eq.s32.totalorder %v2185_v27, %v1838_v34  ;;  %vm4046_vm4 = vcmp.eq.s32.totalorder %v2041_v63, %v1838_v34 }
  0xd8   : > { %1564 = vmatpush.msk.msra.mxu2 %vm4039_vm2, %v1729_v39  ;;  %1589 = vmatpush.msk.msrb.mxu0 %vm4042_vm13, %v1729_v39  ;;  %vm4045_vm2 = vcmp.eq.s32.totalorder %v2084_v5, %v1838_v34  ;;  %vm4048_vm13 = vcmp.eq.s32.totalorder %v1947_v53, %v1906_v49 }
  0xd9   : > { %1577 = vmatpush.msk.msra.mxu3 %vm4041_vm9, %v1729_v39  ;;  %1605 = vmatpush.msk.msrb.mxu1 %vm4044_vm11, %v1729_v39  ;;  %vm4047_vm9 = vcmp.eq.s32.totalorder %v1820_v22, %v1838_v34  ;;  %vm4050_vm11 = vcmp.eq.s32.totalorder %v2074_v3, %v1838_v34  ;;  %v565_v22 = vpop.f32.mrf.mxu0 }
  0xda   : > { %1565 = vmatpush.msk.msra.mxu2 %vm4043_vm6, %v1729_v39  ;;  %1590 = vmatpush.msk.msrb.mxu0 %vm4046_vm4, %v1729_v39  ;;  %vm4049_vm6 = vcmp.eq.s32.totalorder %v2120_v20, %v1838_v34  ;;  %vm967_vm4 = vcmask 891904  }
  0xdb   : > { %1578 = vmatpush.msk.msra.mxu3 %vm4045_vm2, %v1729_v39  ;;  %1606 = vmatpush.msk.msrb.mxu1 %vm4048_vm13, %v1729_v39  ;;  %vm4051_vm2 = vcmp.eq.s32.totalorder %v1833_v32, %v1906_v49  ;;  %vm4053_vm13 = vcmp.eq.s32.totalorder %v2139_v21, %v1838_v34  ;;  %v969_v32 = vsel %vm967_vm4, %v1703_v31, %v964_v37 }
  0xdc   : > { %1566 = vmatpush.msk.msra.mxu2 %vm4047_vm9, %v1729_v39  ;;  %1591 = vmatpush.msk.msrb.mxu0 %vm4050_vm11, %v1729_v39  ;;  %vm4052_vm9 = vcmp.eq.s32.totalorder %v1985_v58, %v1906_v49  ;;  %vm4055_vm11 = vcmp.eq.s32.totalorder %v1836_v33, %v1906_v49  ;;  %v968_v33 = vsel %vm967_vm4, %v1702_v35, %v1703_v31 }
  0xdd   : > { %1579 = vmatpush.msk.msra.mxu3 %vm4049_vm6, %v1729_v39  ;;  %1607 = vmatpush.msk.msrb.mxu1 %vm4052_vm9, %v1729_v39  ;;  %vm4054_vm6 = vcmp.eq.s32.totalorder %v2110_v7, %v1838_v34  ;;  %vm4057_vm9 = vcmp.eq.s32.totalorder %v2188_v28, %v1838_v34  ;;  %v970_v38 = vsel %vm967_vm4, %v964_v37, %v966_v36 }
  0xde   : > { %1615 = vmatpush.msk.msrb.mxu2 %vm4051_vm2, %v1729_v39  ;;  %1592 = vmatpush.msk.msrb.mxu0 %vm4054_vm6, %v1729_v39  ;;  %vm4056_vm2 = vcmp.eq.s32.totalorder %v2015_v61, %v1906_v49  ;;  %vm4059_vm6 = vcmp.eq.s32.totalorder %v2048_v0, %v1906_v49  ;;  %vm4072_vm4 = vcmp.eq.s32.totalorder %v2185_v27, %v1906_v49 }
  0xdf   : > { %1580 = vmatpush.msk.msra.mxu3 %vm4053_vm13, %v1729_v39  ;;  %1608 = vmatpush.msk.msrb.mxu1 %vm4056_vm2, %v1729_v39  ;;  %vm4058_vm13 = vcmp.eq.s32.totalorder %v2146_v23, %v1838_v34  ;;  %vm4061_vm2 = vcmp.eq.s32.totalorder %v2177_v26, %v1838_v34 }
  0xe0   : > { %1616 = vmatpush.msk.msrb.mxu2 %vm4055_vm11, %v1729_v39  ;;  %1593 = vmatpush.msk.msrb.mxu0 %vm4058_vm13, %v1729_v39  ;;  %vm4060_vm11 = vcmp.eq.s32.totalorder %v2218_v29, %v1838_v34  ;;  %vm4065_vm13 = vcmp.eq.s32.totalorder %v2253_v47, %v1838_v34 }
  0xe1   : > { %1581 = vmatpush.msk.msra.mxu3 %vm4057_vm9, %v1729_v39  ;;  %1609 = vmatpush.msk.msrb.mxu1 %vm4059_vm6, %v1729_v39  ;;  %vm4063_vm9 = vcmp.eq.s32.totalorder %v2211_v2, %v1838_v34  ;;  %vm4068_vm6 = vcmp.eq.s32.totalorder %v2280_v48, %v1838_v34 }
  0xe2   : > { %1617 = vmatpush.msk.msrb.mxu2 %vm402_vm3, %v1729_v39  ;;  %1594 = vmatpush.msk.msrb.mxu0 %vm4061_vm2, %v1729_v39  ;;  %vm4062_vm3 = vcmp.eq.s32.totalorder %v1872_v41, %v1906_v49  ;;  %vm4071_vm2 = vcmp.eq.s32.totalorder %v2307_v56, %v1838_v34  ;;  %v605_v34 = vpop.f32.mrf.mxu2 }
  0xe3   : > { %1582 = vmatpush.msk.msra.mxu3 %vm4060_vm11, %v1729_v39  ;;  %990 = vmatmul.f32.vlgmr.msra.gmra.mxu2 %v968_v33  ;;  %vm4069_vm11 = vcmp.eq.s32.totalorder %v2117_v18, %v1906_v49 }
  0xe4   : > { %1010 = vmatmul.f32.vlgmr.msra.gmra.mxu3 %v969_v32  ;;  %1618 = vmatpush.msk.msrb.mxu2 %vm400_vm5, %v1729_v39  ;;  %vm4064_vm5 = vcmp.eq.s32.totalorder %v1882_v43, %v1906_v49 }
  0xe5   : > { %1631 = vmatpush.msk.msrb.mxu3 %vm4062_vm3, %v1729_v39  ;;  %1595 = vmatpush.msk.msrb.mxu0 %vm4063_vm9, %v1729_v39  ;;  %vm4074_vm3 = vcmp.eq.s32.totalorder %v1988_v59, %v1906_v49  ;;  %vm4076_vm9 = vcmp.eq.s32.totalorder %v2018_v62, %v1906_v49 }
  0xe6   : > { %1610 = vmatpush.msk.msrb.mxu1 %vm352_vm12, %v1729_v39  ;;  %1619 = vmatpush.msk.msrb.mxu2 %vm398_vm7, %v1729_v39  ;;  %vm4066_vm12 = vcmp.eq.s32.totalorder %v2103_v6, %v1906_v49  ;;  %vm4067_vm7 = vcmp.eq.s32.totalorder %v1899_v46, %v1906_v49  ;;  %v271_v46 = vadd.f32 1.0, %v263_v11 }
  0xe7   : > { %1632 = vmatpush.msk.msrb.mxu3 %vm4064_vm5, %v1729_v39  ;;  %1596 = vmatpush.msk.msrb.mxu0 %vm4065_vm13, %v1729_v39  ;;  %vm4078_vm5 = vcmp.eq.s32.totalorder %v2051_v1, %v1906_v49  ;;  %vm4079_vm13 = vcmp.eq.s32.totalorder %v2041_v63, %v1906_v49 }
  0xe8   : > { %1611 = vmatpush.msk.msrb.mxu1 %vm4066_vm12, %v1729_v39  ;;  %1620 = vmatpush.msk.msrb.mxu2 %vm396_vm10, %v1729_v39  ;;  %vm4070_vm10 = vcmp.eq.s32.totalorder %v1923_v51, %v1906_v49  ;;  %vm4080_vm12 = vcmp.eq.s32.totalorder %v2084_v5, %v1906_v49  ;;  %v266_v51 = vadd.f32 1.0, %v262_v10  ;;  %v272_v52 = vmax.f32 %v271_v46, 0.0 }
  0xe9   : > { %1633 = vmatpush.msk.msrb.mxu3 %vm4067_vm7, %v1729_v39  ;;  %1597 = vmatpush.msk.msrb.mxu0 %vm4068_vm6, %v1729_v39  ;;  %vm4081_vm7 = vcmp.eq.s32.totalorder %v2074_v3, %v1906_v49  ;;  %vm4082_vm6 = vcmp.eq.s32.totalorder %v2120_v20, %v1906_v49  ;;  %v4091_v5 = vmin.f32 %v1800_v12, 17.0 }
  0xea   : > { %1612 = vmatpush.msk.msrb.mxu1 %vm4069_vm11, %v1729_v39  ;;  %1621 = vmatpush.msk.msrb.mxu2 %vm394_vm0, %v1729_v39  ;;  %vm4073_vm0 = vcmp.eq.s32.totalorder %v1952_v54, %v1906_v49  ;;  %vm4083_vm11 = vcmp.eq.s32.totalorder %v2110_v7, %v1906_v49  ;;  %v625_v41 = vpop.f32.mrf.mxu3  ;;  %v273_v54 = vmin.f32 %v272_v52, 17.0 }
  0xeb   : > { %1634 = vmatpush.msk.msrb.mxu3 %vm4070_vm10, %v1729_v39  ;;  %1598 = vmatpush.msk.msrb.mxu0 %vm4071_vm2, %v1729_v39  ;;  %vm4084_vm10 = vcmp.eq.s32.totalorder %v2139_v21, %v1906_v49  ;;  %vm4085_vm2 = vcmp.eq.s32.totalorder %v2146_v23, %v1906_v49 }
  0xec   : > { %1613 = vmatpush.msk.msrb.mxu1 %vm4072_vm4, %v1729_v39  ;;  %1030 = vmatmul.f32.vlgmr.msrb.gmra.mxu0 %v970_v38  ;;  %vm4086_vm4 = vcmp.eq.s32.totalorder %v2177_v26, %v1906_v49  ;;  %v275_v59 = vsub.f32 %v273_v54, %v1794_v9  ;;  %v277_v10 = vsub.f32 %v273_v54, %v270_v19 }
  0xed   : > { %1622 = vmatpush.msk.msrb.mxu2 %vm392_vm15, %v1729_v39  ;;  %1635 = vmatpush.msk.msrb.mxu3 %vm4073_vm0, %v1729_v39  ;;  %vm4075_vm15 = vcmp.eq.s32.totalorder %v1978_v57, %v1906_v49  ;;  %vm4087_vm0 = vcmp.eq.s32.totalorder %v2211_v2, %v1906_v49  ;;  %v586_v2 = vadd.f32 %v585_v40, %v565_v22 }
  0xee   : > { %1614 = vmatpush.msk.msrb.mxu1 %vm344_vm8, %v1729_v39  ;;  %vm4077_vm8 = vcmp.eq.s32.totalorder %v2008_v60, %v1906_v49  ;;  %v645_v42 = vpop.f32.mrf.mxu0  ;;  %v279_v62 = vsub.f32 1.0, %v275_v59 }
  0xef   : > { %1623 = vmatpush.msk.msrb.mxu2 %vm4074_vm3, %v1729_v39  ;;  %1050 = vmatmul.f32.vlgmr.msrb.gmra.mxu1 %v968_v33  ;;  %vm4089_vm3 = vcmp.eq.s32.totalorder %v2280_v48, %v1906_v49  ;;  %v646_v20 = vadd.f32 %v645_v42, %v625_v41  ;;  %v606_v37 = vadd.f32 %v605_v34, %v586_v2 }
  0xf0   : > { %1636 = vmatpush.msk.msrb.mxu3 %vm4075_vm15, %v1729_v39  ;;  %vm1131_vm15 = vcmask 1043456  }
  0xf1   : > { %1624 = vmatpush.msk.msrb.mxu2 %vm4076_vm9, %v1729_v39 }
  0xf2   : > { %1637 = vmatpush.msk.msrb.mxu3 %vm4077_vm8, %v1729_v39 }
  0xf3   : > { %1625 = vmatpush.msk.msrb.mxu2 %vm4078_vm5, %v1729_v39 }
  0xf4   : > { %1638 = vmatpush.msk.msrb.mxu3 %vm4079_vm13, %v1729_v39 }
  0xf5   : > { %1626 = vmatpush.msk.msrb.mxu2 %vm4080_vm12, %v1729_v39 }
  0xf6   : > { %1639 = vmatpush.msk.msrb.mxu3 %vm4081_vm7, %v1729_v39  ;;  %v665_v44 = vpop.f32.mrf.mxu1 }
  0xf7   : > { %1627 = vmatpush.msk.msrb.mxu2 %vm4082_vm6, %v1729_v39 }
  0xf8   : > { %1640 = vmatpush.msk.msrb.mxu3 %vm4083_vm11, %v1729_v39 }
  0xf9   : > { %1628 = vmatpush.msk.msrb.mxu2 %vm4084_vm10, %v1729_v39 }
  0xfa   : > { %1641 = vmatpush.msk.msrb.mxu3 %vm4085_vm2, %v1729_v39 }
  0xfb   : > { %1629 = vmatpush.msk.msrb.mxu2 %vm378_vm1, %v1729_v39  ;;  %vm4088_vm1 = vcmp.eq.s32.totalorder %v2253_v47, %v1906_v49  ;;  %v666_v47 = vadd.f32 %v665_v44, %v646_v20 }
  0xfc   : > { %1642 = vmatpush.msk.msrb.mxu3 %vm4086_vm4, %v1729_v39 }
  0xfd   : > { %1630 = vmatpush.msk.msrb.mxu2 %vm376_vm14, %v1729_v39  ;;  %vm4090_vm14 = vcmp.eq.s32.totalorder %v2307_v56, %v1906_v49  ;;  %v267_v49 = vmax.f32 %v266_v51, 0.0 }
  0xfe   : > { %1643 = vmatpush.msk.msrb.mxu3 %vm4087_vm0, %v1729_v39  ;;  %1070 = vmatmul.f32.vlgmr.msrb.gmra.mxu2 %v969_v32 }
  0xff   : > { %v268_v58 = vmin.f32 %v267_v49, 17.0 }
 0x100   : > { %1644 = vmatpush.msk.msrb.mxu3 %vm4088_vm1, %v1729_v39 }
 0x101   : > { %v274_v61 = vsub.f32 %v268_v58, %v1792_v8  ;;  %v276_v6 = vsub.f32 %v268_v58, %v4091_v5 }
 0x102   : > { %1645 = vmatpush.msk.msrb.mxu3 %vm4089_vm3, %v1729_v39 }
 0x103   : > { %v282_v11 = vsub.f32 1.0, %v274_v61  ;;  %v280_v1 = vmul.f32 %v279_v62, %v274_v61  ;;  %v278_v9 = vmul.f32 %v275_v59, %v274_v61 }
 0x104   : > { %1646 = vmatpush.msk.msrb.mxu3 %vm4090_vm14, %v1729_v39 }
 0x105   : > { %1090 = vmatmul.f32.vlgmr.msrb.gmra.mxu3 %v970_v38  ;;  %v285_v4 = vmul.f32 %v282_v11, %v279_v62  ;;  %v283_v7 = vmul.f32 %v282_v11, %v275_v59  ;;  %v281_v21 = vmul.f32 %v280_v1, %v277_v10  ;;  %v1096_v29 = vperm.slane %v278_v9, 1 }
 0x106   : > { %v1095_v30 = vperm.slane %v278_v9, 0 }
 0x107   : > { %v286_v28 = vmul.f32 %v285_v4, %v276_v6  ;;  %v284_v16 = vmul.f32 %v283_v7, %v276_v6  ;;  %v1103_v56 = vperm.slane %v281_v21, 1  ;;  %v1102_v13 = vperm.slane %v281_v21, 0 }
 0x108   : > { %v1100_v38 = vmul.f32 %v1096_v29, %v666_v47 }
 0x109   : > { %v1112_v14 = vperm.slane %v284_v16, 1  ;;  %v287_v24 = vmul.f32 %v286_v28, %v277_v10  ;;  %v1111_v36 = vperm.slane %v284_v16, 0 }
 0x116   : > { %v767_v39 = vpop.f32.mrf.mxu1 }
 0x11c   : > { %v707_v43 = vpop.f32.mrf.mxu2 }
 0x11d   : > { %v747_v50 = vpop.f32.mrf.mxu0 }
 0x122   : > { %v727_v45 = vpop.f32.mrf.mxu3 }
 0x123   : > { %v728_v23 = vadd.f32 %v727_v45, %v707_v43  ;;  %v1120_v43 = vperm.slane %v287_v24, 0  ;;  %v1121_v45 = vperm.slane %v287_v24, 1 }
 0x125   : > { %v787_v53 = vpop.f32.mrf.mxu2  ;;  %v748_v12 = vadd.f32 %v747_v50, %v728_v23  ;;  %v1099_v50 = vmul.f32 %v1095_v30, %v606_v37 }
 0x126   : > { %v788_v27 = vadd.f32 %v787_v53, %v767_v39 }
 0x127   : > { %v1106_v22 = vmul.f32 %v1102_v13, %v748_v12 }
 0x129   : > { %v1108_v49 = vadd.f32 %v1106_v22, %v1099_v50 }
 0x12c   : > { %v807_v55 = vpop.f32.mrf.mxu3 }
 0x12d   : > { %v808_v48 = vadd.f32 %v807_v55, %v788_v27 }
 0x12f   : > { %v1107_v32 = vmul.f32 %v1103_v56, %v808_v48 }
 0x131   : > { %v1109_v51 = vadd.f32 %v1107_v32, %v1100_v38 }
 0x13d   : > { %v849_v57 = vpop.f32.mrf.mxu0  ;;  %v869_v63 = vpop.f32.mrf.mxu1 }
 0x13e   : > { %v889_v60 = vpop.f32.mrf.mxu2  ;;  %v870_v17 = vadd.f32 %v869_v63, %v849_v57 }
 0x140   : > { %v890_v33 = vadd.f32 %v889_v60, %v870_v17 }
 0x142   : > { %v1115_v52 = vmul.f32 %v1111_v36, %v890_v33 }
 0x144   : > { %v1117_v55 = vadd.f32 %v1115_v52, %v1108_v49 }
 0x146   : > { %v909_v0 = vpop.f32.mrf.mxu3  ;;  %v929_v3 = vpop.f32.mrf.mxu0 }
 0x147   : > { %v930_v8 = vadd.f32 %v929_v3, %v909_v0 }
 0x149   : > { %v949_v26 = vpop.f32.mrf.mxu1 }
 0x14a   : > { %v950_v15 = vadd.f32 %v949_v26, %v930_v8 }
 0x14c   : > { %v1116_v40 = vmul.f32 %v1112_v14, %v950_v15 }
 0x14e   : > { %v1118_v39 = vadd.f32 %v1116_v40, %v1109_v51 }
 0x166   : > { %v991_v18 = vpop.f32.mrf.mxu2 }
 0x167   : > { %v1011_v19 = vpop.f32.mrf.mxu3 }
 0x168   : > { %v1012_v25 = vadd.f32 %v1011_v19, %v991_v18 }
 0x169   : > { %v1031_v31 = vpop.f32.mrf.mxu0 }
 0x16a   : > { %v1032_v42 = vadd.f32 %v1031_v31, %v1012_v25 }
 0x16c   : > { %v1051_v41 = vpop.f32.mrf.mxu1  ;;  %v1124_v34 = vmul.f32 %v1120_v43, %v1032_v42 }
 0x16e   : > { %v1126_v58 = vadd.f32 %v1124_v34, %v1117_v55 }
 0x181   : > { %v1071_v35 = vpop.f32.mrf.mxu2 }
 0x182   : > { %v1072_v44 = vadd.f32 %v1071_v35, %v1051_v41 }
 0x188   : > { %v1091_v46 = vpop.f32.mrf.mxu3 }
 0x189   : > { %v1092_v53 = vadd.f32 %v1091_v46, %v1072_v44 }
 0x18b   : > { %v1125_v54 = vmul.f32 %v1121_v45, %v1092_v53 }
 0x18d   : > { %v1127_v57 = vadd.f32 %v1125_v54, %v1118_v39 }
 0x18f   : > { %v1130_v59 = vrot.slane %v1127_v57, 4 }
 0x191   : > { %v1132_v60 = vsel %vm1131_vm15, %v1126_v58, %v1130_v59 }
 0x192   : > { %1134 = vst [vmem:[%s250_s7] sm:$0xff] %v1132_v60 }
 0x193 PF: > { %s13_s14 = sadd.s32 1, %s1726_s14   ;;  %s4092_s12 = smov %s1722_s13 }
 0x194   : > { %p10_p5 = scmp.ge.s32.totalorder %s13_s14, 4   ;;  %s4093_s13 = smov %s4095_s15 }
 0x196   :  { %12 = sbr.rel (!%p10_p5) target bundleno = 2 (0x2), region = 74 }

</bundles_post_ra>
